<compile_context>
chip_gen: v5e
topology: v5e:2x2
jax: 0.10.0
libtpu: 0.0.40
codegen_flags: <defaults>
</compile_context>

<pallas_src>
import functools

import jax
import jax.numpy as jnp
from jax.experimental import pallas as pl
from jax.experimental.pallas import tpu as pltpu


# ----------------------------------------------------------------------------
# helpers that the original repo defines elsewhere (reasonable reconstructions)
# ----------------------------------------------------------------------------
def gen_dx_bx(xbound, ybound, zbound):
    dx = jnp.array([b[2] for b in (xbound, ybound, zbound)], jnp.float32)
    bx = jnp.array([b[0] + b[2] / 2.0 for b in (xbound, ybound, zbound)], jnp.float32)
    nx = jnp.array([int((b[1] - b[0]) / b[2]) for b in (xbound, ybound, zbound)], jnp.int32)
    return dx, bx, nx


def get_canvas_w(xbound):
    return int((xbound[1] - xbound[0]) / xbound[2])


def get_fov_mask(xbound, ybound, out_h, out_w):
    # TODO(synk): real get_fov_mask (camera FoV rasterisation) not provided; all-ones mask.
    return jnp.ones((out_h, out_w), jnp.float32)


def _pick_tile(dim, target):
    """Largest divisor of dim that is <= target and a multiple of 8, else dim (full)."""
    if dim <= target:
        return dim
    for t in range(target, 0, -1):
        if dim % t == 0 and t % 8 == 0:
            return t
    return dim


def _pick_lane_tile(dim, target):
    """Largest divisor of dim that is <= target and a multiple of 128, else dim (full)."""
    if dim <= target:
        return dim
    start = target - (target % 128)
    for t in range(start, 0, -128):
        if dim % t == 0:
            return t
    return dim


# ----------------------------------------------------------------------------
# Pallas kernels
# ----------------------------------------------------------------------------
def _linear_kernel(x_ref, w_ref, b_ref, o_ref, *, relu):
    y = jnp.dot(x_ref[...], w_ref[...], preferred_element_type=jnp.float32) + b_ref[...]
    if relu:
        y = jnp.maximum(y, 0.0)
    o_ref[...] = y


def linear_pallas(x, w, b=None, relu=False, tm_target=512):
    """y = x @ w + b (optionally ReLU). x:(M,K), w:(K,N). M-tiled, bf16 operands."""
    M, K = x.shape
    _, N = w.shape
    if b is None:
        b = jnp.zeros((N,), jnp.float32)
    tm = _pick_tile(M, tm_target)
    return pl.pallas_call(
        functools.partial(_linear_kernel, relu=relu),
        out_shape=jax.ShapeDtypeStruct((M, N), jnp.float32),
        grid=(M // tm,),
        in_specs=[
            pl.BlockSpec((tm, K), lambda i: (i, 0)),
            pl.BlockSpec((K, N), lambda i: (0, 0)),
            pl.BlockSpec((1, N), lambda i: (0, 0)),
        ],
        out_specs=pl.BlockSpec((tm, N), lambda i: (i, 0)),
        compiler_params=pltpu.CompilerParams(dimension_semantics=("parallel",)),
    )(x.astype(jnp.bfloat16), w.astype(jnp.bfloat16),
      b.reshape(1, N).astype(jnp.float32))


def _view_fusion_kernel(x_ref, w1_ref, b1_ref, w2_ref, b2_ref, o_ref, acc_ref, *, inv_n):
    """Per (view v, k-tile kt): h_tile = relu(x @ w1[:,kt] + b1[kt]);
    acc += h_tile @ w2[kt,:]; at last kt: out += relu(acc + b2) / n_views."""
    v = pl.program_id(0)
    kt = pl.program_id(1)
    nk = pl.num_programs(1)

    @pl.when(jnp.logical_and(v == 0, kt == 0))
    def _():
        o_ref[...] = jnp.zeros_like(o_ref)

    @pl.when(kt == 0)
    def _():
        acc_ref[...] = jnp.zeros_like(acc_ref)

    x = x_ref[0]                                                  # (B*C, fv_dim) bf16
    h = jnp.dot(x, w1_ref[0], preferred_element_type=jnp.float32) + b1_ref[0]
    h = jnp.maximum(h, 0.0)                                       # (B*C, tk) f32
    acc_ref[...] += jnp.dot(h.astype(jnp.bfloat16), w2_ref[0],
                            preferred_element_type=jnp.float32)   # (B*C, bv_dim)

    @pl.when(kt == nk - 1)
    def _():
        y = jnp.maximum(acc_ref[...] + b2_ref[0], 0.0)
        o_ref[...] += y * inv_n


def view_fusion_mean_pallas(feat, w1, b1, w2, b2, tk_target=1024):
    """Fused ViewTransformation (per-view Linear->ReLU->Linear->ReLU) + mean over views.
    feat:(N,B*C,fv_dim); w1:(N,fv_dim,bv_dim); w2:(N,bv_dim,bv_dim) -> (B*C, bv_dim)."""
    n_views, BC, fv_dim = feat.shape
    bv_dim = w1.shape[-1]
    tk = _pick_lane_tile(bv_dim, tk_target)
    nk = bv_dim // tk
    b1r = b1.reshape(n_views, 1, bv_dim).astype(jnp.float32)
    b2r = b2.reshape(n_views, 1, bv_dim).astype(jnp.float32)
    return pl.pallas_call(
        functools.partial(_view_fusion_kernel, inv_n=1.0 / n_views),
        out_shape=jax.ShapeDtypeStruct((BC, bv_dim), jnp.float32),
        grid=(n_views, nk),
        in_specs=[
            pl.BlockSpec((1, BC, fv_dim), lambda v, k: (v, 0, 0)),
            pl.BlockSpec((1, fv_dim, tk), lambda v, k: (v, 0, k)),
            pl.BlockSpec((1, 1, tk), lambda v, k: (v, 0, k)),
            pl.BlockSpec((1, tk, bv_dim), lambda v, k: (v, k, 0)),
            pl.BlockSpec((1, 1, bv_dim), lambda v, k: (v, 0, 0)),
        ],
        out_specs=pl.BlockSpec((BC, bv_dim), lambda v, k: (0, 0)),
        scratch_shapes=[pltpu.VMEM((BC, bv_dim), jnp.float32)],
        compiler_params=pltpu.CompilerParams(
            dimension_semantics=("arbitrary", "arbitrary")),
    )(feat.astype(jnp.bfloat16), w1.astype(jnp.bfloat16), b1r,
      w2.astype(jnp.bfloat16), b2r)


def _upsample_kernel(x_ref, ah_ref, awt_ref, o_ref):
    """out[g] = Ah @ x[g] @ Aw^T  (fused bilinear x2, align_corners=True)."""
    ah = ah_ref[...]                       # (2H, H)
    awt = awt_ref[...]                     # (W, 2W)
    for g in range(x_ref.shape[0]):
        y = jnp.dot(ah, x_ref[g], preferred_element_type=jnp.float32)      # (2H, W)
        o_ref[g] = jnp.dot(y, awt, preferred_element_type=jnp.float32)     # (2H, 2W)


def _interp_matrix(n_in, n_out):
    """Bilinear interpolation matrix, align_corners=True (out = M @ in)."""
    if n_in == 1:
        return jnp.ones((n_out, 1), jnp.float32)
    pos = jnp.arange(n_out, dtype=jnp.float32) * (n_in - 1) / (n_out - 1)
    i0 = jnp.clip(jnp.floor(pos).astype(jnp.int32), 0, n_in - 2)
    frac = pos - i0.astype(jnp.float32)
    m = jnp.zeros((n_out, n_in), jnp.float32)
    m = m.at[jnp.arange(n_out), i0].add(1.0 - frac)
    m = m.at[jnp.arange(n_out), i0 + 1].add(frac)
    return m


def upsample2x_bilinear(x):
    """nn.Upsample(scale_factor=2, mode='bilinear', align_corners=True), x NCHW."""
    B, C, H, W = x.shape
    ah = _interp_matrix(H, 2 * H)           # (2H, H)
    awt = _interp_matrix(W, 2 * W).T        # (W, 2W)
    BC = B * C
    G = _pick_tile(BC, 16)
    out = pl.pallas_call(
        _upsample_kernel,
        out_shape=jax.ShapeDtypeStruct((BC, 2 * H, 2 * W), jnp.float32),
        grid=(BC // G,),
        in_specs=[
            pl.BlockSpec((G, H, W), lambda i: (i, 0, 0)),
            pl.BlockSpec((2 * H, H), lambda i: (0, 0)),
            pl.BlockSpec((W, 2 * W), lambda i: (0, 0)),
        ],
        out_specs=pl.BlockSpec((G, 2 * H, 2 * W), lambda i: (i, 0, 0)),
        compiler_params=pltpu.CompilerParams(dimension_semantics=("parallel",)),
    )(x.reshape(BC, H, W).astype(jnp.float32), ah, awt)
    return out.reshape(B, C, 2 * H, 2 * W)


# ----------------------------------------------------------------------------
# pure-JAX glue
# ----------------------------------------------------------------------------
def get_Ks_RTs_and_post_RTs(intrins, rots, trans):
    B, N = intrins.shape[:2]
    eye = jnp.broadcast_to(jnp.eye(4, dtype=jnp.float32), (B, N, 4, 4))
    Ks = eye
    Rs = eye.at[..., :3, :3].set(jnp.swapaxes(rots, -1, -2))
    Ts = eye.at[..., :3, 3].set(-trans)
    RTs = Rs @ Ts
    return Ks, RTs, None


# ----------------------------------------------------------------------------
# HDMapNetMono
# ----------------------------------------------------------------------------
class HDMapNetMono:
    def __init__(self, data_conf, instance_seg=True, embedded_dim=16,
                 direction_pred=True, direction_dim=36, n_views=6, seed=42):
        self.camC = 64
        self.downsample = 16
        self.data_conf = data_conf
        self.n_views = n_views
        self.embedded_dim = embedded_dim
        self.direction_dim = direction_dim + 1

        dx, bx, nx = gen_dx_bx(data_conf['xbound'], data_conf['ybound'], data_conf['zbound'])
        final_H, final_W = int(nx[1]), get_canvas_w(data_conf['xbound'])
        self.fv_size = (data_conf['image_size'][0] // self.downsample,
                        data_conf['image_size'][1] // self.downsample)
        self.bv_size = (final_H // 5, final_W // 5)
        res_x = self.bv_size[1] * 3 // 4
        self.ipm_xbound = [0, res_x, 2 * res_x / final_W]        # kept for fidelity
        self.ipm_ybound = [-res_x, res_x, 4 * res_x / final_H]   # TODO(synk): used only by the real IPM

        fv_dim = self.fv_size[0] * self.fv_size[1]
        bv_dim = self.bv_size[0] * self.bv_size[1]
        self.fv_dim, self.bv_dim = fv_dim, bv_dim
        patch_dim = 3 * self.downsample * self.downsample

        key = jax.random.PRNGKey(seed)
        ks = jax.random.split(key, 10)
        s = 0.05
        nc = data_conf['num_channels']
        params = {
            # TODO(synk): CamEncode (EfficientNet) not provided; stand-in patch projection.
            'cam_w': s * jax.random.normal(ks[0], (patch_dim, self.camC), jnp.float32),
            'cam_b': jnp.zeros((self.camC,), jnp.float32),
            # ViewTransformation (exact semantics)
            'vt_w1': s * jax.random.normal(ks[1], (n_views, fv_dim, bv_dim), jnp.float32),
            'vt_b1': 0.01 * jnp.ones((n_views, bv_dim), jnp.float32),
            'vt_w2': s * jax.random.normal(ks[2], (n_views, bv_dim, bv_dim), jnp.float32),
            'vt_b2': 0.01 * jnp.ones((n_views, bv_dim), jnp.float32),
            # TODO(synk): BevEncode ResNet trunk not provided; 1x1-conv heads stand-in.
            'seg_w': s * jax.random.normal(ks[3], (self.camC, nc), jnp.float32),
            'seg_b': jnp.zeros((nc,), jnp.float32),
            'emb_w': s * jax.random.normal(ks[4], (self.camC, embedded_dim), jnp.float32),
            'emb_b': jnp.zeros((embedded_dim,), jnp.float32),
            'dir_w': s * jax.random.normal(ks[5], (self.camC, self.direction_dim), jnp.float32),
            'dir_b': jnp.zeros((self.direction_dim,), jnp.float32),
        }
        # Fused head: [seg | emb | dir] columns, padded to a multiple of 64 lanes, with the
        # bias appended as an extra contraction row (so mask*(x@W+b) == [mask*x, mask]@W_aug).
        self.n_head_out = nc + embedded_dim + self.direction_dim          # 4+16+37 = 57
        n_pad = ((self.n_head_out + 63) // 64) * 64
        w_all = jnp.concatenate([params['seg_w'], params['emb_w'], params['dir_w']], axis=1)
        b_all = jnp.concatenate([params['seg_b'], params['emb_b'], params['dir_b']])
        w_all = jnp.pad(w_all, ((0, 0), (0, n_pad - self.n_head_out)))
        b_all = jnp.pad(b_all, (0, n_pad - self.n_head_out))
        params['head_w_aug'] = jnp.concatenate([w_all, b_all[None, :]], axis=0)  # (camC+1, n_pad)
        self.params = params

    # --- CamEncode stand-in: 16x16 patch linear projection to camC (M-tiled Pallas matmul)
    def get_cam_feats(self, img):
        B, N, C, imH, imW = img.shape
        d = self.downsample
        fH, fW = imH // d, imW // d
        # TODO(synk): patch extraction (im2col) is one host-side XLA transpose pass; a
        #             BlockSpec-driven in-kernel gather would remove it but is not dominant.
        x = img.reshape(B, N, C, fH, d, fW, d)
        x = jnp.transpose(x, (0, 1, 3, 5, 2, 4, 6)).reshape(B * N * fH * fW, C * d * d)
        x = linear_pallas(x, self.params['cam_w'], self.params['cam_b'], relu=True)
        x = x.reshape(B, N, fH, fW, self.camC)
        return jnp.transpose(x, (0, 1, 4, 2, 3))          # (B, N, camC, fH, fW)

    # --- ViewTransformation (exact) fused with the mean-over-views IPM stand-in
    def view_fusion_and_ipm(self, feat):
        B, N, C, H, W = feat.shape
        x = feat.reshape(B, N, C, H * W)
        x = jnp.transpose(x, (1, 0, 2, 3)).reshape(N, B * C, H * W)      # (N, B*C, fv_dim)
        # TODO(synk): real IPM (homography warp using Ks/RTs) not provided; views are fused
        #             by mean, computed inside the same Pallas kernel as the view MLP.
        out = view_fusion_mean_pallas(x, self.params['vt_w1'], self.params['vt_b1'],
                                      self.params['vt_w2'], self.params['vt_b2'])
        return out.reshape(B, C, self.bv_size[0], self.bv_size[1])       # (B, C, bvH, bvW)

    # --- fused BevEncode heads (1x1 convs) with fov-mask folded in
    def bev_heads(self, topdown):
        B, C, H2, W2 = topdown.shape
        fov_mask = get_fov_mask(self.data_conf['xbound'], self.data_conf['ybound'], H2, W2)
        # mask*(x@W+b) == [mask*x, mask] @ [[W],[b]]  -> no (M,1) mask block inside the kernel.
        feat = jnp.transpose(topdown, (0, 2, 3, 1)) * fov_mask[None, :, :, None]
        M = B * H2 * W2
        feat2d = feat.reshape(M, C)
        mask_col = jnp.broadcast_to(fov_mask.reshape(1, H2, W2, 1), (B, H2, W2, 1)).reshape(M, 1)
        x_aug = jnp.concatenate([feat2d, mask_col], axis=1)               # (M, C+1)
        y = linear_pallas(x_aug, self.params['head_w_aug'], b=None, relu=False)   # (M, n_pad)
        y = jnp.transpose(y.reshape(B, H2, W2, -1), (0, 3, 1, 2))         # (B, n_pad, H2, W2)
        nc = self.data_conf['num_channels']
        pred = y[:, :nc]
        pred_embedded = y[:, nc:nc + self.embedded_dim]
        pred_direction = y[:, nc + self.embedded_dim:self.n_head_out]
        return pred, pred_embedded, pred_direction

    def forward(self, img, trans, rots, intrins, post_trans, post_rots,
                lidar_data, lidar_mask, car_trans, yaw_pitch_roll):
        x = self.get_cam_feats(img)                       # (B, N, 64, fH, fW)
        Ks, RTs, post_RTs = get_Ks_RTs_and_post_RTs(intrins, rots, trans)  # kept for fidelity
        topdown = self.view_fusion_and_ipm(x)             # (B, 64, bvH, bvW)
        topdown = upsample2x_bilinear(topdown)            # (B, 64, 2*bvH, 2*bvW)
        return self.bev_heads(topdown)


# ----------------------------------------------------------------------------
if __name__ == "__main__":
    data_conf = {
        'image_size': (32, 64),
        'xbound': [-20.0, 20.0, 1.0],     # final_W = 40
        'ybound': [-10.0, 10.0, 1.0],     # final_H = 20
        'zbound': [-10.0, 10.0, 20.0],
        'num_channels': 4,
    }
    model = HDMapNetMono(data_conf, embedded_dim=16, direction_dim=36)

    B, N = 2, 6
    key = jax.random.PRNGKey(0)
    k = jax.random.split(key, 10)
    img = jax.random.normal(k[0], (B, N, 3, 32, 64), jnp.float32)
    trans = jax.random.normal(k[1], (B, N, 3), jnp.float32)
    rots = jax.random.normal(k[2], (B, N, 3, 3), jnp.float32)
    intrins = jax.random.normal(k[3], (B, N, 3, 3), jnp.float32)
    post_trans = jax.random.normal(k[4], (B, N, 3), jnp.float32)
    post_rots = jax.random.normal(k[5], (B, N, 3, 3), jnp.float32)
    lidar_data = jax.random.normal(k[6], (B, 8, 5), jnp.float32)   # unused by forward
    lidar_mask = jnp.ones((B, 8), jnp.float32)                     # unused by forward
    car_trans = jax.random.normal(k[7], (B, 3), jnp.float32)
    yaw_pitch_roll = jax.random.normal(k[8], (B, 3), jnp.float32)

    fwd = jax.jit(model.forward)
    pred, pred_emb, pred_dir = fwd(img, trans, rots, intrins, post_trans,
                                   post_rots, lidar_data, lidar_mask,
                                   car_trans, yaw_pitch_roll)
    jax.block_until_ready((pred, pred_emb, pred_dir))
    assert pred.shape == (B, 4, 8, 16)
    assert pred_emb.shape == (B, 16, 8, 16)
    assert pred_dir.shape == (B, 37, 8, 16)
    print("KERNEL_OK")
</pallas_src>

<mosaic_0001>
module attributes {stable_mosaic.version = 11 : i64} {
  func.func @_linear_kernel(%arg0: i32, %arg1: memref<96x768xbf16, #tpu.memory_space<vmem>>, %arg2: memref<768x64xbf16, #tpu.memory_space<vmem>>, %arg3: memref<1x64xf32, #tpu.memory_space<vmem>>, %arg4: memref<96x64xf32, #tpu.memory_space<vmem>>) attributes {dimension_semantics = [#tpu.dimension_semantics<parallel>], iteration_bounds = array<i64: 1>, scalar_prefetch = 0 : i64, scratch_operands = 0 : i64, tpu.core_type = #tpu.core_type<tc>, window_params = [{transform_indices = @transform_0, window_bounds = array<i64: 96, 768>}, {pipeline_mode = #tpu.pipeline_mode<synchronous>, transform_indices = @transform_1, window_bounds = array<i64: 768, 64>}, {pipeline_mode = #tpu.pipeline_mode<synchronous>, transform_indices = @transform_2, window_bounds = array<i64: 1, 64>}, {transform_indices = @transform_3, window_bounds = array<i64: 96, 64>}]} {
    %c0 = arith.constant 0 : index
    %c0_0 = arith.constant 0 : index
    %0 = vector.load %arg1[%c0, %c0_0] : memref<96x768xbf16, #tpu.memory_space<vmem>>, vector<96x768xbf16>
    %c0_1 = arith.constant 0 : index
    %c0_2 = arith.constant 0 : index
    %1 = vector.load %arg2[%c0_1, %c0_2] : memref<768x64xbf16, #tpu.memory_space<vmem>>, vector<768x64xbf16>
    %cst = arith.constant dense<0.000000e+00> : vector<96x64xf32>
    %2 = tpu.matmul %0, %1, %cst {dimension_numbers = #tpu.dot_dimension_numbers<[1], [0], [0], [1], [0, 0, 1, 1], [], []>} : vector<96x768xbf16>, vector<768x64xbf16>, vector<96x64xf32> -> vector<96x64xf32>
    %c0_3 = arith.constant 0 : index
    %c0_4 = arith.constant 0 : index
    %3 = vector.load %arg3[%c0_3, %c0_4] : memref<1x64xf32, #tpu.memory_space<vmem>>, vector<1x64xf32>
    %4 = vector.broadcast %3 : vector<1x64xf32> to vector<96x64xf32>
    %5 = arith.addf %2, %4 : vector<96x64xf32>
    %cst_5 = arith.constant 0.000000e+00 : f32
    %6 = vector.broadcast %cst_5 : f32 to vector<96x64xf32>
    %7 = arith.maximumf %5, %6 : vector<96x64xf32>
    %c0_6 = arith.constant 0 : index
    %c0_7 = arith.constant 0 : index
    %8 = vector.load %arg4[%c0_6, %c0_7] : memref<96x64xf32, #tpu.memory_space<vmem>>, vector<96x64xf32>
    tpu.vector_store %arg4[%c0_6, %c0_7], %7 {strides = array<i32>} : memref<96x64xf32, #tpu.memory_space<vmem>>, vector<96x64xf32>,
    return
  }
  func.func @transform_0(%arg0: i32) -> (i32, i32) {
    %c0_i32 = arith.constant 0 : i32
    %c0_i32_0 = arith.constant 0 : i32
    return %arg0, %c0_i32 : i32, i32
  }
  func.func @transform_1(%arg0: i32) -> (i32, i32) {
    %c0_i32 = arith.constant 0 : i32
    %c0_i32_0 = arith.constant 0 : i32
    %c0_i32_1 = arith.constant 0 : i32
    return %c0_i32, %c0_i32_0 : i32, i32
  }
  func.func @transform_2(%arg0: i32) -> (i32, i32) {
    %c0_i32 = arith.constant 0 : i32
    %c0_i32_0 = arith.constant 0 : i32
    %c0_i32_1 = arith.constant 0 : i32
    return %c0_i32, %c0_i32_0 : i32, i32
  }
  func.func @transform_3(%arg0: i32) -> (i32, i32) {
    %c0_i32 = arith.constant 0 : i32
    %c0_i32_0 = arith.constant 0 : i32
    return %arg0, %c0_i32 : i32, i32
  }
}

module attributes {stable_mosaic.version = 11 : i64} {
  func.func @_view_fusion_kernel(%arg0: i32, %arg1: i32, %arg2: memref<1x128x8xbf16, #tpu.memory_space<vmem>>, %arg3: memref<1x8x32xbf16, #tpu.memory_space<vmem>>, %arg4: memref<1x1x32xf32, #tpu.memory_space<vmem>>, %arg5: memref<1x32x32xbf16, #tpu.memory_space<vmem>>, %arg6: memref<1x1x32xf32, #tpu.memory_space<vmem>>, %arg7: memref<128x32xf32, #tpu.memory_space<vmem>>, %arg8: memref<128x32xf32, #tpu.memory_space<vmem>>) attributes {dimension_semantics = [#tpu.dimension_semantics<arbitrary>, #tpu.dimension_semantics<arbitrary>], iteration_bounds = array<i64: 6, 1>, scalar_prefetch = 0 : i64, scratch_operands = 1 : i64, tpu.core_type = #tpu.core_type<tc>, window_params = [{transform_indices = @transform_0, window_bounds = array<i64: 1, 128, 8>}, {transform_indices = @transform_1, window_bounds = array<i64: 1, 8, 32>}, {transform_indices = @transform_2, window_bounds = array<i64: 1, 1, 32>}, {transform_indices = @transform_3, window_bounds = array<i64: 1, 32, 32>}, {transform_indices = @transform_4, window_bounds = array<i64: 1, 1, 32>}, {pipeline_mode = #tpu.pipeline_mode<synchronous>, transform_indices = @transform_5, window_bounds = array<i64: 128, 32>}]} {
    %c0_i32 = arith.constant 0 : i32
    %0 = arith.cmpi eq, %arg0, %c0_i32 : i32
    %c0_i32_0 = arith.constant 0 : i32
    %1 = arith.cmpi eq, %arg1, %c0_i32_0 : i32
    %2 = arith.andi %0, %1 : i1
    %3 = arith.extui %2 : i1 to i32
    %c0_i32_1 = arith.constant 0 : i32
    %4 = arith.cmpi ne, %3, %c0_i32_1 : i32
    scf.if %4 {
      %cst_23 = arith.constant 0.000000e+00 : f32
      %29 = vector.broadcast %cst_23 : f32 to vector<128x32xf32>
      %c0_24 = arith.constant 0 : index
      %c0_25 = arith.constant 0 : index
      %30 = vector.load %arg7[%c0_24, %c0_25] : memref<128x32xf32, #tpu.memory_space<vmem>>, vector<128x32xf32>
      tpu.vector_store %arg7[%c0_24, %c0_25], %29 {strides = array<i32>} : memref<128x32xf32, #tpu.memory_space<vmem>>, vector<128x32xf32>,
    } else {
    }
    %c0_i32_2 = arith.constant 0 : i32
    %5 = arith.cmpi eq, %arg1, %c0_i32_2 : i32
    %6 = arith.extui %5 : i1 to i32
    %c0_i32_3 = arith.constant 0 : i32
    %7 = arith.cmpi ne, %6, %c0_i32_3 : i32
    scf.if %7 {
      %cst_23 = arith.constant 0.000000e+00 : f32
      %29 = vector.broadcast %cst_23 : f32 to vector<128x32xf32>
      %c0_24 = arith.constant 0 : index
      %c0_25 = arith.constant 0 : index
      %30 = vector.load %arg8[%c0_24, %c0_25] : memref<128x32xf32, #tpu.memory_space<vmem>>, vector<128x32xf32>
      tpu.vector_store %arg8[%c0_24, %c0_25], %29 {strides = array<i32>} : memref<128x32xf32, #tpu.memory_space<vmem>>, vector<128x32xf32>,
    } else {
    }
    %c0 = arith.constant 0 : index
    %c0_4 = arith.constant 0 : index
    %c0_5 = arith.constant 0 : index
    %8 = vector.load %arg2[%c0, %c0_4, %c0_5] : memref<1x128x8xbf16, #tpu.memory_space<vmem>>, vector<1x128x8xbf16>
    %9 = vector.shape_cast %8 : vector<1x128x8xbf16> to vector<128x8xbf16>
    %c0_6 = arith.constant 0 : index
    %c0_7 = arith.constant 0 : index
    %c0_8 = arith.constant 0 : index
    %10 = vector.load %arg3[%c0_6, %c0_7, %c0_8] : memref<1x8x32xbf16, #tpu.memory_space<vmem>>, vector<1x8x32xbf16>
    %11 = vector.shape_cast %10 : vector<1x8x32xbf16> to vector<8x32xbf16>
    %cst = arith.constant dense<0.000000e+00> : vector<128x32xf32>
    %12 = tpu.matmul %9, %11, %cst {dimension_numbers = #tpu.dot_dimension_numbers<[1], [0], [0], [1], [0, 0, 1, 1], [], []>} : vector<128x8xbf16>, vector<8x32xbf16>, vector<128x32xf32> -> vector<128x32xf32>
    %c0_9 = arith.constant 0 : index
    %c0_10 = arith.constant 0 : index
    %c0_11 = arith.constant 0 : index
    %13 = vector.load %arg4[%c0_9, %c0_10, %c0_11] : memref<1x1x32xf32, #tpu.memory_space<vmem>>, vector<1x1x32xf32>
    %14 = vector.shape_cast %13 : vector<1x1x32xf32> to vector<1x32xf32>
    %15 = vector.broadcast %14 : vector<1x32xf32> to vector<128x32xf32>
    %16 = arith.addf %12, %15 : vector<128x32xf32>
    %cst_12 = arith.constant 0.000000e+00 : f32
    %17 = vector.broadcast %cst_12 : f32 to vector<128x32xf32>
    %18 = arith.maximumf %16, %17 : vector<128x32xf32>
    %c0_13 = arith.constant 0 : index
    %c0_14 = arith.constant 0 : index
    %19 = vector.load %arg8[%c0_13, %c0_14] : memref<128x32xf32, #tpu.memory_space<vmem>>, vector<128x32xf32>
    %20 = arith.truncf %18 : vector<128x32xf32> to vector<128x32xbf16>
    %c0_15 = arith.constant 0 : index
    %c0_16 = arith.constant 0 : index
    %c0_17 = arith.constant 0 : index
    %21 = vector.load %arg5[%c0_15, %c0_16, %c0_17] : memref<1x32x32xbf16, #tpu.memory_space<vmem>>, vector<1x32x32xbf16>
    %22 = vector.shape_cast %21 : vector<1x32x32xbf16> to vector<32x32xbf16>
    %cst_18 = arith.constant dense<0.000000e+00> : vector<128x32xf32>
    %23 = tpu.matmul %20, %22, %cst_18 {dimension_numbers = #tpu.dot_dimension_numbers<[1], [0], [0], [1], [0, 0, 1, 1], [], []>} : vector<128x32xbf16>, vector<32x32xbf16>, vector<128x32xf32> -> vector<128x32xf32>
    %24 = arith.addf %19, %23 : vector<128x32xf32>
    %c0_19 = arith.constant 0 : index
    %c0_20 = arith.constant 0 : index
    %25 = vector.load %arg8[%c0_19, %c0_20] : memref<128x32xf32, #tpu.memory_space<vmem>>, vector<128x32xf32>
    tpu.vector_store %arg8[%c0_19, %c0_20], %24 {strides = array<i32>} : memref<128x32xf32, #tpu.memory_space<vmem>>, vector<128x32xf32>,
    %c0_i32_21 = arith.constant 0 : i32
    %26 = arith.cmpi eq, %arg1, %c0_i32_21 : i32
    %27 = arith.extui %26 : i1 to i32
    %c0_i32_22 = arith.constant 0 : i32
    %28 = arith.cmpi ne, %27, %c0_i32_22 : i32
    scf.if %28 {
      %c0_23 = arith.constant 0 : index
      %c0_24 = arith.constant 0 : index
      %29 = vector.load %arg8[%c0_23, %c0_24] : memref<128x32xf32, #tpu.memory_space<vmem>>, vector<128x32xf32>
      %c0_25 = arith.constant 0 : index
      %c0_26 = arith.constant 0 : index
      %c0_27 = arith.constant 0 : index
      %30 = vector.load %arg6[%c0_25, %c0_26, %c0_27] : memref<1x1x32xf32, #tpu.memory_space<vmem>>, vector<1x1x32xf32>
      %31 = vector.shape_cast %30 : vector<1x1x32xf32> to vector<1x32xf32>
      %32 = vector.broadcast %31 : vector<1x32xf32> to vector<128x32xf32>
      %33 = arith.addf %29, %32 : vector<128x32xf32>
      %cst_28 = arith.constant 0.000000e+00 : f32
      %34 = vector.broadcast %cst_28 : f32 to vector<128x32xf32>
      %35 = arith.maximumf %33, %34 : vector<128x32xf32>
      %c0_29 = arith.constant 0 : index
      %c0_30 = arith.constant 0 : index
      %36 = vector.load %arg7[%c0_29, %c0_30] : memref<128x32xf32, #tpu.memory_space<vmem>>, vector<128x32xf32>
      %cst_31 = arith.constant 0.166666672 : f32
      %37 = vector.broadcast %cst_31 : f32 to vector<128x32xf32>
      %38 = arith.mulf %35, %37 : vector<128x32xf32>
      %39 = arith.addf %36, %38 : vector<128x32xf32>
      %c0_32 = arith.constant 0 : index
      %c0_33 = arith.constant 0 : index
      %40 = vector.load %arg7[%c0_32, %c0_33] : memref<128x32xf32, #tpu.memory_space<vmem>>, vector<128x32xf32>
      tpu.vector_store %arg7[%c0_32, %c0_33], %39 {strides = array<i32>} : memref<128x32xf32, #tpu.memory_space<vmem>>, vector<128x32xf32>,
    } else {
    }
    return
  }
  func.func @transform_0(%arg0: i32, %arg1: i32) -> (i32, i32, i32) {
    %c0_i32 = arith.constant 0 : i32
    %c0_i32_0 = arith.constant 0 : i32
    %c0_i32_1 = arith.constant 0 : i32
    return %arg0, %c0_i32, %c0_i32_0 : i32, i32, i32
  }
  func.func @transform_1(%arg0: i32, %arg1: i32) -> (i32, i32, i32) {
    %c0_i32 = arith.constant 0 : i32
    %c0_i32_0 = arith.constant 0 : i32
    return %arg0, %c0_i32, %arg1 : i32, i32, i32
  }
  func.func @transform_2(%arg0: i32, %arg1: i32) -> (i32, i32, i32) {
    %c0_i32 = arith.constant 0 : i32
    %c0_i32_0 = arith.constant 0 : i32
    return %arg0, %c0_i32, %arg1 : i32, i32, i32
  }
  func.func @transform_3(%arg0: i32, %arg1: i32) -> (i32, i32, i32) {
    %c0_i32 = arith.constant 0 : i32
    %c0_i32_0 = arith.constant 0 : i32
    return %arg0, %arg1, %c0_i32 : i32, i32, i32
  }
  func.func @transform_4(%arg0: i32, %arg1: i32) -> (i32, i32, i32) {
    %c0_i32 = arith.constant 0 : i32
    %c0_i32_0 = arith.constant 0 : i32
    %c0_i32_1 = arith.constant 0 : i32
    return %arg0, %c0_i32, %c0_i32_0 : i32, i32, i32
  }
  func.func @transform_5(%arg0: i32, %arg1: i32) -> (i32, i32) {
    %c0_i32 = arith.constant 0 : i32
    %c0_i32_0 = arith.constant 0 : i32
    %c0_i32_1 = arith.constant 0 : i32
    return %c0_i32, %c0_i32_0 : i32, i32
  }
}

module attributes {stable_mosaic.version = 11 : i64} {
  func.func @_upsample_kernel(%arg0: i32, %arg1: memref<16x4x8xf32, #tpu.memory_space<vmem>>, %arg2: memref<8x4xf32, #tpu.memory_space<vmem>>, %arg3: memref<8x16xf32, #tpu.memory_space<vmem>>, %arg4: memref<16x8x16xf32, #tpu.memory_space<vmem>>) attributes {dimension_semantics = [#tpu.dimension_semantics<parallel>], iteration_bounds = array<i64: 8>, scalar_prefetch = 0 : i64, scratch_operands = 0 : i64, tpu.core_type = #tpu.core_type<tc>, window_params = [{transform_indices = @transform_0, window_bounds = array<i64: 16, 4, 8>}, {pipeline_mode = #tpu.pipeline_mode<synchronous>, transform_indices = @transform_1, window_bounds = array<i64: 8, 4>}, {pipeline_mode = #tpu.pipeline_mode<synchronous>, transform_indices = @transform_2, window_bounds = array<i64: 8, 16>}, {transform_indices = @transform_3, window_bounds = array<i64: 16, 8, 16>}]} {
    %c0 = arith.constant 0 : index
    %c0_0 = arith.constant 0 : index
    %0 = vector.load %arg2[%c0, %c0_0] : memref<8x4xf32, #tpu.memory_space<vmem>>, vector<8x4xf32>
    %c0_1 = arith.constant 0 : index
    %c0_2 = arith.constant 0 : index
    %1 = vector.load %arg3[%c0_1, %c0_2] : memref<8x16xf32, #tpu.memory_space<vmem>>, vector<8x16xf32>
    %c0_3 = arith.constant 0 : index
    %c0_4 = arith.constant 0 : index
    %c0_5 = arith.constant 0 : index
    %2 = vector.load %arg1[%c0_3, %c0_4, %c0_5] : memref<16x4x8xf32, #tpu.memory_space<vmem>>, vector<1x4x8xf32>
    %3 = vector.shape_cast %2 : vector<1x4x8xf32> to vector<4x8xf32>
    %cst = arith.constant dense<0.000000e+00> : vector<8x8xf32>
    %4 = tpu.matmul %0, %3, %cst {dimension_numbers = #tpu.dot_dimension_numbers<[1], [0], [0], [1], [0, 0, 1, 1], [], []>} : vector<8x4xf32>, vector<4x8xf32>, vector<8x8xf32> -> vector<8x8xf32>
    %cst_6 = arith.constant dense<0.000000e+00> : vector<8x16xf32>
    %5 = tpu.matmul %4, %1, %cst_6 {dimension_numbers = #tpu.dot_dimension_numbers<[1], [0], [0], [1], [0, 0, 1, 1], [], []>} : vector<8x8xf32>, vector<8x16xf32>, vector<8x16xf32> -> vector<8x16xf32>
    %c0_7 = arith.constant 0 : index
    %c0_8 = arith.constant 0 : index
    %c0_9 = arith.constant 0 : index
    %6 = vector.load %arg4[%c0_7, %c0_8, %c0_9] : memref<16x8x16xf32, #tpu.memory_space<vmem>>, vector<1x8x16xf32>
    %7 = vector.shape_cast %6 : vector<1x8x16xf32> to vector<8x16xf32>
    %8 = vector.shape_cast %5 : vector<8x16xf32> to vector<1x8x16xf32>
    tpu.vector_store %arg4[%c0_7, %c0_8, %c0_9], %8 {strides = array<i32>} : memref<16x8x16xf32, #tpu.memory_space<vmem>>, vector<1x8x16xf32>,
    %c1 = arith.constant 1 : index
    %c0_10 = arith.constant 0 : index
    %c0_11 = arith.constant 0 : index
    %9 = vector.load %arg1[%c1, %c0_10, %c0_11] : memref<16x4x8xf32, #tpu.memory_space<vmem>>, vector<1x4x8xf32>
    %10 = vector.shape_cast %9 : vector<1x4x8xf32> to vector<4x8xf32>
    %cst_12 = arith.constant dense<0.000000e+00> : vector<8x8xf32>
    %11 = tpu.matmul %0, %10, %cst_12 {dimension_numbers = #tpu.dot_dimension_numbers<[1], [0], [0], [1], [0, 0, 1, 1], [], []>} : vector<8x4xf32>, vector<4x8xf32>, vector<8x8xf32> -> vector<8x8xf32>
    %cst_13 = arith.constant dense<0.000000e+00> : vector<8x16xf32>
    %12 = tpu.matmul %11, %1, %cst_13 {dimension_numbers = #tpu.dot_dimension_numbers<[1], [0], [0], [1], [0, 0, 1, 1], [], []>} : vector<8x8xf32>, vector<8x16xf32>, vector<8x16xf32> -> vector<8x16xf32>
    %c1_14 = arith.constant 1 : index
    %c0_15 = arith.constant 0 : index
    %c0_16 = arith.constant 0 : index
    %13 = vector.load %arg4[%c1_14, %c0_15, %c0_16] : memref<16x8x16xf32, #tpu.memory_space<vmem>>, vector<1x8x16xf32>
    %14 = vector.shape_cast %13 : vector<1x8x16xf32> to vector<8x16xf32>
    %15 = vector.shape_cast %12 : vector<8x16xf32> to vector<1x8x16xf32>
    tpu.vector_store %arg4[%c1_14, %c0_15, %c0_16], %15 {strides = array<i32>} : memref<16x8x16xf32, #tpu.memory_space<vmem>>, vector<1x8x16xf32>,
    %c2 = arith.constant 2 : index
    %c0_17 = arith.constant 0 : index
    %c0_18 = arith.constant 0 : index
    %16 = vector.load %arg1[%c2, %c0_17, %c0_18] : memref<16x4x8xf32, #tpu.memory_space<vmem>>, vector<1x4x8xf32>
    %17 = vector.shape_cast %16 : vector<1x4x8xf32> to vector<4x8xf32>
    %cst_19 = arith.constant dense<0.000000e+00> : vector<8x8xf32>
    %18 = tpu.matmul %0, %17, %cst_19 {dimension_numbers = #tpu.dot_dimension_numbers<[1], [0], [0], [1], [0, 0, 1, 1], [], []>} : vector<8x4xf32>, vector<4x8xf32>, vector<8x8xf32> -> vector<8x8xf32>
    %cst_20 = arith.constant dense<0.000000e+00> : vector<8x16xf32>
    %19 = tpu.matmul %18, %1, %cst_20 {dimension_numbers = #tpu.dot_dimension_numbers<[1], [0], [0], [1], [0, 0, 1, 1], [], []>} : vector<8x8xf32>, vector<8x16xf32>, vector<8x16xf32> -> vector<8x16xf32>
    %c2_21 = arith.constant 2 : index
    %c0_22 = arith.constant 0 : index
    %c0_23 = arith.constant 0 : index
    %20 = vector.load %arg4[%c2_21, %c0_22, %c0_23] : memref<16x8x16xf32, #tpu.memory_space<vmem>>, vector<1x8x16xf32>
    %21 = vector.shape_cast %20 : vector<1x8x16xf32> to vector<8x16xf32>
    %22 = vector.shape_cast %19 : vector<8x16xf32> to vector<1x8x16xf32>
    tpu.vector_store %arg4[%c2_21, %c0_22, %c0_23], %22 {strides = array<i32>} : memref<16x8x16xf32, #tpu.memory_space<vmem>>, vector<1x8x16xf32>,
    %c3 = arith.constant 3 : index
    %c0_24 = arith.constant 0 : index
    %c0_25 = arith.constant 0 : index
    %23 = vector.load %arg1[%c3, %c0_24, %c0_25] : memref<16x4x8xf32, #tpu.memory_space<vmem>>, vector<1x4x8xf32>
    %24 = vector.shape_cast %23 : vector<1x4x8xf32> to vector<4x8xf32>
    %cst_26 = arith.constant dense<0.000000e+00> : vector<8x8xf32>
    %25 = tpu.matmul %0, %24, %cst_26 {dimension_numbers = #tpu.dot_dimension_numbers<[1], [0], [0], [1], [0, 0, 1, 1], [], []>} : vector<8x4xf32>, vector<4x8xf32>, vector<8x8xf32> -> vector<8x8xf32>
    %cst_27 = arith.constant dense<0.000000e+00> : vector<8x16xf32>
    %26 = tpu.matmul %25, %1, %cst_27 {dimension_numbers = #tpu.dot_dimension_numbers<[1], [0], [0], [1], [0, 0, 1, 1], [], []>} : vector<8x8xf32>, vector<8x16xf32>, vector<8x16xf32> -> vector<8x16xf32>
    %c3_28 = arith.constant 3 : index
    %c0_29 = arith.constant 0 : index
    %c0_30 = arith.constant 0 : index
    %27 = vector.load %arg4[%c3_28, %c0_29, %c0_30] : memref<16x8x16xf32, #tpu.memory_space<vmem>>, vector<1x8x16xf32>
    %28 = vector.shape_cast %27 : vector<1x8x16xf32> to vector<8x16xf32>
    %29 = vector.shape_cast %26 : vector<8x16xf32> to vector<1x8x16xf32>
    tpu.vector_store %arg4[%c3_28, %c0_29, %c0_30], %29 {strides = array<i32>} : memref<16x8x16xf32, #tpu.memory_space<vmem>>, vector<1x8x16xf32>,
    %c4 = arith.constant 4 : index
    %c0_31 = arith.constant 0 : index
    %c0_32 = arith.constant 0 : index
    %30 = vector.load %arg1[%c4, %c0_31, %c0_32] : memref<16x4x8xf32, #tpu.memory_space<vmem>>, vector<1x4x8xf32>
    %31 = vector.shape_cast %30 : vector<1x4x8xf32> to vector<4x8xf32>
    %cst_33 = arith.constant dense<0.000000e+00> : vector<8x8xf32>
    %32 = tpu.matmul %0, %31, %cst_33 {dimension_numbers = #tpu.dot_dimension_numbers<[1], [0], [0], [1], [0, 0, 1, 1], [], []>} : vector<8x4xf32>, vector<4x8xf32>, vector<8x8xf32> -> vector<8x8xf32>
    %cst_34 = arith.constant dense<0.000000e+00> : vector<8x16xf32>
    %33 = tpu.matmul %32, %1, %cst_34 {dimension_numbers = #tpu.dot_dimension_numbers<[1], [0], [0], [1], [0, 0, 1, 1], [], []>} : vector<8x8xf32>, vector<8x16xf32>, vector<8x16xf32> -> vector<8x16xf32>
    %c4_35 = arith.constant 4 : index
    %c0_36 = arith.constant 0 : index
    %c0_37 = arith.constant 0 : index
    %34 = vector.load %arg4[%c4_35, %c0_36, %c0_37] : memref<16x8x16xf32, #tpu.memory_space<vmem>>, vector<1x8x16xf32>
    %35 = vector.shape_cast %34 : vector<1x8x16xf32> to vector<8x16xf32>
    %36 = vector.shape_cast %33 : vector<8x16xf32> to vector<1x8x16xf32>
    tpu.vector_store %arg4[%c4_35, %c0_36, %c0_37], %36 {strides = array<i32>} : memref<16x8x16xf32, #tpu.memory_space<vmem>>, vector<1x8x16xf32>,
    %c5 = arith.constant 5 : index
    %c0_38 = arith.constant 0 : index
    %c0_39 = arith.constant 0 : index
    %37 = vector.load %arg1[%c5, %c0_38, %c0_39] : memref<16x4x8xf32, #tpu.memory_space<vmem>>, vector<1x4x8xf32>
    %38 = vector.shape_cast %37 : vector<1x4x8xf32> to vector<4x8xf32>
    %cst_40 = arith.constant dense<0.000000e+00> : vector<8x8xf32>
    %39 = tpu.matmul %0, %38, %cst_40 {dimension_numbers = #tpu.dot_dimension_numbers<[1], [0], [0], [1], [0, 0, 1, 1], [], []>} : vector<8x4xf32>, vector<4x8xf32>, vector<8x8xf32> -> vector<8x8xf32>
    %cst_41 = arith.constant dense<0.000000e+00> : vector<8x16xf32>
    %40 = tpu.matmul %39, %1, %cst_41 {dimension_numbers = #tpu.dot_dimension_numbers<[1], [0], [0], [1], [0, 0, 1, 1], [], []>} : vector<8x8xf32>, vector<8x16xf32>, vector<8x16xf32> -> vector<8x16xf32>
    %c5_42 = arith.constant 5 : index
    %c0_43 = arith.constant 0 : index
    %c0_44 = arith.constant 0 : index
    %41 = vector.load %arg4[%c5_42, %c0_43, %c0_44] : memref<16x8x16xf32, #tpu.memory_space<vmem>>, vector<1x8x16xf32>
    %42 = vector.shape_cast %41 : vector<1x8x16xf32> to vector<8x16xf32>
    %43 = vector.shape_cast %40 : vector<8x16xf32> to vector<1x8x16xf32>
    tpu.vector_store %arg4[%c5_42, %c0_43, %c0_44], %43 {strides = array<i32>} : memref<16x8x16xf32, #tpu.memory_space<vmem>>, vector<1x8x16xf32>,
    %c6 = arith.constant 6 : index
    %c0_45 = arith.constant 0 : index
    %c0_46 = arith.constant 0 : index
    %44 = vector.load %arg1[%c6, %c0_45, %c0_46] : memref<16x4x8xf32, #tpu.memory_space<vmem>>, vector<1x4x8xf32>
    %45 = vector.shape_cast %44 : vector<1x4x8xf32> to vector<4x8xf32>
    %cst_47 = arith.constant dense<0.000000e+00> : vector<8x8xf32>
    %46 = tpu.matmul %0, %45, %cst_47 {dimension_numbers = #tpu.dot_dimension_numbers<[1], [0], [0], [1], [0, 0, 1, 1], [], []>} : vector<8x4xf32>, vector<4x8xf32>, vector<8x8xf32> -> vector<8x8xf32>
    %cst_48 = arith.constant dense<0.000000e+00> : vector<8x16xf32>
    %47 = tpu.matmul %46, %1, %cst_48 {dimension_numbers = #tpu.dot_dimension_numbers<[1], [0], [0], [1], [0, 0, 1, 1], [], []>} : vector<8x8xf32>, vector<8x16xf32>, vector<8x16xf32> -> vector<8x16xf32>
    %c6_49 = arith.constant 6 : index
    %c0_50 = arith.constant 0 : index
    %c0_51 = arith.constant 0 : index
    %48 = vector.load %arg4[%c6_49, %c0_50, %c0_51] : memref<16x8x16xf32, #tpu.memory_space<vmem>>, vector<1x8x16xf32>
    %49 = vector.shape_cast %48 : vector<1x8x16xf32> to vector<8x16xf32>
    %50 = vector.shape_cast %47 : vector<8x16xf32> to vector<1x8x16xf32>
    tpu.vector_store %arg4[%c6_49, %c0_50, %c0_51], %50 {strides = array<i32>} : memref<16x8x16xf32, #tpu.memory_space<vmem>>, vector<1x8x16xf32>,
    %c7 = arith.constant 7 : index
    %c0_52 = arith.constant 0 : index
    %c0_53 = arith.constant 0 : index
    %51 = vector.load %arg1[%c7, %c0_52, %c0_53] : memref<16x4x8xf32, #tpu.memory_space<vmem>>, vector<1x4x8xf32>
    %52 = vector.shape_cast %51 : vector<1x4x8xf32> to vector<4x8xf32>
    %cst_54 = arith.constant dense<0.000000e+00> : vector<8x8xf32>
    %53 = tpu.matmul %0, %52, %cst_54 {dimension_numbers = #tpu.dot_dimension_numbers<[1], [0], [0], [1], [0, 0, 1, 1], [], []>} : vector<8x4xf32>, vector<4x8xf32>, vector<8x8xf32> -> vector<8x8xf32>
    %cst_55 = arith.constant dense<0.000000e+00> : vector<8x16xf32>
    %54 = tpu.matmul %53, %1, %cst_55 {dimension_numbers = #tpu.dot_dimension_numbers<[1], [0], [0], [1], [0, 0, 1, 1], [], []>} : vector<8x8xf32>, vector<8x16xf32>, vector<8x16xf32> -> vector<8x16xf32>
    %c7_56 = arith.constant 7 : index
    %c0_57 = arith.constant 0 : index
    %c0_58 = arith.constant 0 : index
    %55 = vector.load %arg4[%c7_56, %c0_57, %c0_58] : memref<16x8x16xf32, #tpu.memory_space<vmem>>, vector<1x8x16xf32>
    %56 = vector.shape_cast %55 : vector<1x8x16xf32> to vector<8x16xf32>
    %57 = vector.shape_cast %54 : vector<8x16xf32> to vector<1x8x16xf32>
    tpu.vector_store %arg4[%c7_56, %c0_57, %c0_58], %57 {strides = array<i32>} : memref<16x8x16xf32, #tpu.memory_space<vmem>>, vector<1x8x16xf32>,
    %c8 = arith.constant 8 : index
    %c0_59 = arith.constant 0 : index
    %c0_60 = arith.constant 0 : index
    %58 = vector.load %arg1[%c8, %c0_59, %c0_60] : memref<16x4x8xf32, #tpu.memory_space<vmem>>, vector<1x4x8xf32>
    %59 = vector.shape_cast %58 : vector<1x4x8xf32> to vector<4x8xf32>
    %cst_61 = arith.constant dense<0.000000e+00> : vector<8x8xf32>
    %60 = tpu.matmul %0, %59, %cst_61 {dimension_numbers = #tpu.dot_dimension_numbers<[1], [0], [0], [1], [0, 0, 1, 1], [], []>} : vector<8x4xf32>, vector<4x8xf32>, vector<8x8xf32> -> vector<8x8xf32>
    %cst_62 = arith.constant dense<0.000000e+00> : vector<8x16xf32>
    %61 = tpu.matmul %60, %1, %cst_62 {dimension_numbers = #tpu.dot_dimension_numbers<[1], [0], [0], [1], [0, 0, 1, 1], [], []>} : vector<8x8xf32>, vector<8x16xf32>, vector<8x16xf32> -> vector<8x16xf32>
    %c8_63 = arith.constant 8 : index
    %c0_64 = arith.constant 0 : index
    %c0_65 = arith.constant 0 : index
    %62 = vector.load %arg4[%c8_63, %c0_64, %c0_65] : memref<16x8x16xf32, #tpu.memory_space<vmem>>, vector<1x8x16xf32>
    %63 = vector.shape_cast %62 : vector<1x8x16xf32> to vector<8x16xf32>
    %64 = vector.shape_cast %61 : vector<8x16xf32> to vector<1x8x16xf32>
    tpu.vector_store %arg4[%c8_63, %c0_64, %c0_65], %64 {strides = array<i32>} : memref<16x8x16xf32, #tpu.memory_space<vmem>>, vector<1x8x16xf32>,
    %c9 = arith.constant 9 : index
    %c0_66 = arith.constant 0 : index
    %c0_67 = arith.constant 0 : index
    %65 = vector.load %arg1[%c9, %c0_66, %c0_67] : memref<16x4x8xf32, #tpu.memory_space<vmem>>, vector<1x4x8xf32>
    %66 = vector.shape_cast %65 : vector<1x4x8xf32> to vector<4x8xf32>
    %cst_68 = arith.constant dense<0.000000e+00> : vector<8x8xf32>
    %67 = tpu.matmul %0, %66, %cst_68 {dimension_numbers = #tpu.dot_dimension_numbers<[1], [0], [0], [1], [0, 0, 1, 1], [], []>} : vector<8x4xf32>, vector<4x8xf32>, vector<8x8xf32> -> vector<8x8xf32>
    %cst_69 = arith.constant dense<0.000000e+00> : vector<8x16xf32>
    %68 = tpu.matmul %67, %1, %cst_69 {dimension_numbers = #tpu.dot_dimension_numbers<[1], [0], [0], [1], [0, 0, 1, 1], [], []>} : vector<8x8xf32>, vector<8x16xf32>, vector<8x16xf32> -> vector<8x16xf32>
    %c9_70 = arith.constant 9 : index
    %c0_71 = arith.constant 0 : index
    %c0_72 = arith.constant 0 : index
    %69 = vector.load %arg4[%c9_70, %c0_71, %c0_72] : memref<16x8x16xf32, #tpu.memory_space<vmem>>, vector<1x8x16xf32>
    %70 = vector.shape_cast %69 : vector<1x8x16xf32> to vector<8x16xf32>
    %71 = vector.shape_cast %68 : vector<8x16xf32> to vector<1x8x16xf32>
    tpu.vector_store %arg4[%c9_70, %c0_71, %c0_72], %71 {strides = array<i32>} : memref<16x8x16xf32, #tpu.memory_space<vmem>>, vector<1x8x16xf32>,
    %c10 = arith.constant 10 : index
    %c0_73 = arith.constant 0 : index
    %c0_74 = arith.constant 0 : index
    %72 = vector.load %arg1[%c10, %c0_73, %c0_74] : memref<16x4x8xf32, #tpu.memory_space<vmem>>, vector<1x4x8xf32>
    %73 = vector.shape_cast %72 : vector<1x4x8xf32> to vector<4x8xf32>
    %cst_75 = arith.constant dense<0.000000e+00> : vector<8x8xf32>
    %74 = tpu.matmul %0, %73, %cst_75 {dimension_numbers = #tpu.dot_dimension_numbers<[1], [0], [0], [1], [0, 0, 1, 1], [], []>} : vector<8x4xf32>, vector<4x8xf32>, vector<8x8xf32> -> vector<8x8xf32>
    %cst_76 = arith.constant dense<0.000000e+00> : vector<8x16xf32>
    %75 = tpu.matmul %74, %1, %cst_76 {dimension_numbers = #tpu.dot_dimension_numbers<[1], [0], [0], [1], [0, 0, 1, 1], [], []>} : vector<8x8xf32>, vector<8x16xf32>, vector<8x16xf32> -> vector<8x16xf32>
    %c10_77 = arith.constant 10 : index
    %c0_78 = arith.constant 0 : index
    %c0_79 = arith.constant 0 : index
    %76 = vector.load %arg4[%c10_77, %c0_78, %c0_79] : memref<16x8x16xf32, #tpu.memory_space<vmem>>, vector<1x8x16xf32>
    %77 = vector.shape_cast %76 : vector<1x8x16xf32> to vector<8x16xf32>
    %78 = vector.shape_cast %75 : vector<8x16xf32> to vector<1x8x16xf32>
    tpu.vector_store %arg4[%c10_77, %c0_78, %c0_79], %78 {strides = array<i32>} : memref<16x8x16xf32, #tpu.memory_space<vmem>>, vector<1x8x16xf32>,
    %c11 = arith.constant 11 : index
    %c0_80 = arith.constant 0 : index
    %c0_81 = arith.constant 0 : index
    %79 = vector.load %arg1[%c11, %c0_80, %c0_81] : memref<16x4x8xf32, #tpu.memory_space<vmem>>, vector<1x4x8xf32>
    %80 = vector.shape_cast %79 : vector<1x4x8xf32> to vector<4x8xf32>
    %cst_82 = arith.constant dense<0.000000e+00> : vector<8x8xf32>
    %81 = tpu.matmul %0, %80, %cst_82 {dimension_numbers = #tpu.dot_dimension_numbers<[1], [0], [0], [1], [0, 0, 1, 1], [], []>} : vector<8x4xf32>, vector<4x8xf32>, vector<8x8xf32> -> vector<8x8xf32>
    %cst_83 = arith.constant dense<0.000000e+00> : vector<8x16xf32>
    %82 = tpu.matmul %81, %1, %cst_83 {dimension_numbers = #tpu.dot_dimension_numbers<[1], [0], [0], [1], [0, 0, 1, 1], [], []>} : vector<8x8xf32>, vector<8x16xf32>, vector<8x16xf32> -> vector<8x16xf32>
    %c11_84 = arith.constant 11 : index
    %c0_85 = arith.constant 0 : index
    %c0_86 = arith.constant 0 : index
    %83 = vector.load %arg4[%c11_84, %c0_85, %c0_86] : memref<16x8x16xf32, #tpu.memory_space<vmem>>, vector<1x8x16xf32>
    %84 = vector.shape_cast %83 : vector<1x8x16xf32> to vector<8x16xf32>
    %85 = vector.shape_cast %82 : vector<8x16xf32> to vector<1x8x16xf32>
    tpu.vector_store %arg4[%c11_84, %c0_85, %c0_86], %85 {strides = array<i32>} : memref<16x8x16xf32, #tpu.memory_space<vmem>>, vector<1x8x16xf32>,
    %c12 = arith.constant 12 : index
    %c0_87 = arith.constant 0 : index
    %c0_88 = arith.constant 0 : index
    %86 = vector.load %arg1[%c12, %c0_87, %c0_88] : memref<16x4x8xf32, #tpu.memory_space<vmem>>, vector<1x4x8xf32>
    %87 = vector.shape_cast %86 : vector<1x4x8xf32> to vector<4x8xf32>
    %cst_89 = arith.constant dense<0.000000e+00> : vector<8x8xf32>
    %88 = tpu.matmul %0, %87, %cst_89 {dimension_numbers = #tpu.dot_dimension_numbers<[1], [0], [0], [1], [0, 0, 1, 1], [], []>} : vector<8x4xf32>, vector<4x8xf32>, vector<8x8xf32> -> vector<8x8xf32>
    %cst_90 = arith.constant dense<0.000000e+00> : vector<8x16xf32>
    %89 = tpu.matmul %88, %1, %cst_90 {dimension_numbers = #tpu.dot_dimension_numbers<[1], [0], [0], [1], [0, 0, 1, 1], [], []>} : vector<8x8xf32>, vector<8x16xf32>, vector<8x16xf32> -> vector<8x16xf32>
    %c12_91 = arith.constant 12 : index
    %c0_92 = arith.constant 0 : index
    %c0_93 = arith.constant 0 : index
    %90 = vector.load %arg4[%c12_91, %c0_92, %c0_93] : memref<16x8x16xf32, #tpu.memory_space<vmem>>, vector<1x8x16xf32>
    %91 = vector.shape_cast %90 : vector<1x8x16xf32> to vector<8x16xf32>
    %92 = vector.shape_cast %89 : vector<8x16xf32> to vector<1x8x16xf32>
    tpu.vector_store %arg4[%c12_91, %c0_92, %c0_93], %92 {strides = array<i32>} : memref<16x8x16xf32, #tpu.memory_space<vmem>>, vector<1x8x16xf32>,
    %c13 = arith.constant 13 : index
    %c0_94 = arith.constant 0 : index
    %c0_95 = arith.constant 0 : index
    %93 = vector.load %arg1[%c13, %c0_94, %c0_95] : memref<16x4x8xf32, #tpu.memory_space<vmem>>, vector<1x4x8xf32>
    %94 = vector.shape_cast %93 : vector<1x4x8xf32> to vector<4x8xf32>
    %cst_96 = arith.constant dense<0.000000e+00> : vector<8x8xf32>
    %95 = tpu.matmul %0, %94, %cst_96 {dimension_numbers = #tpu.dot_dimension_numbers<[1], [0], [0], [1], [0, 0, 1, 1], [], []>} : vector<8x4xf32>, vector<4x8xf32>, vector<8x8xf32> -> vector<8x8xf32>
    %cst_97 = arith.constant dense<0.000000e+00> : vector<8x16xf32>
    %96 = tpu.matmul %95, %1, %cst_97 {dimension_numbers = #tpu.dot_dimension_numbers<[1], [0], [0], [1], [0, 0, 1, 1], [], []>} : vector<8x8xf32>, vector<8x16xf32>, vector<8x16xf32> -> vector<8x16xf32>
    %c13_98 = arith.constant 13 : index
    %c0_99 = arith.constant 0 : index
    %c0_100 = arith.constant 0 : index
    %97 = vector.load %arg4[%c13_98, %c0_99, %c0_100] : memref<16x8x16xf32, #tpu.memory_space<vmem>>, vector<1x8x16xf32>
    %98 = vector.shape_cast %97 : vector<1x8x16xf32> to vector<8x16xf32>
    %99 = vector.shape_cast %96 : vector<8x16xf32> to vector<1x8x16xf32>
    tpu.vector_store %arg4[%c13_98, %c0_99, %c0_100], %99 {strides = array<i32>} : memref<16x8x16xf32, #tpu.memory_space<vmem>>, vector<1x8x16xf32>,
    %c14 = arith.constant 14 : index
    %c0_101 = arith.constant 0 : index
    %c0_102 = arith.constant 0 : index
    %100 = vector.load %arg1[%c14, %c0_101, %c0_102] : memref<16x4x8xf32, #tpu.memory_space<vmem>>, vector<1x4x8xf32>
    %101 = vector.shape_cast %100 : vector<1x4x8xf32> to vector<4x8xf32>
    %cst_103 = arith.constant dense<0.000000e+00> : vector<8x8xf32>
    %102 = tpu.matmul %0, %101, %cst_103 {dimension_numbers = #tpu.dot_dimension_numbers<[1], [0], [0], [1], [0, 0, 1, 1], [], []>} : vector<8x4xf32>, vector<4x8xf32>, vector<8x8xf32> -> vector<8x8xf32>
    %cst_104 = arith.constant dense<0.000000e+00> : vector<8x16xf32>
    %103 = tpu.matmul %102, %1, %cst_104 {dimension_numbers = #tpu.dot_dimension_numbers<[1], [0], [0], [1], [0, 0, 1, 1], [], []>} : vector<8x8xf32>, vector<8x16xf32>, vector<8x16xf32> -> vector<8x16xf32>
    %c14_105 = arith.constant 14 : index
    %c0_106 = arith.constant 0 : index
    %c0_107 = arith.constant 0 : index
    %104 = vector.load %arg4[%c14_105, %c0_106, %c0_107] : memref<16x8x16xf32, #tpu.memory_space<vmem>>, vector<1x8x16xf32>
    %105 = vector.shape_cast %104 : vector<1x8x16xf32> to vector<8x16xf32>
    %106 = vector.shape_cast %103 : vector<8x16xf32> to vector<1x8x16xf32>
    tpu.vector_store %arg4[%c14_105, %c0_106, %c0_107], %106 {strides = array<i32>} : memref<16x8x16xf32, #tpu.memory_space<vmem>>, vector<1x8x16xf32>,
    %c15 = arith.constant 15 : index
    %c0_108 = arith.constant 0 : index
    %c0_109 = arith.constant 0 : index
    %107 = vector.load %arg1[%c15, %c0_108, %c0_109] : memref<16x4x8xf32, #tpu.memory_space<vmem>>, vector<1x4x8xf32>
    %108 = vector.shape_cast %107 : vector<1x4x8xf32> to vector<4x8xf32>
    %cst_110 = arith.constant dense<0.000000e+00> : vector<8x8xf32>
    %109 = tpu.matmul %0, %108, %cst_110 {dimension_numbers = #tpu.dot_dimension_numbers<[1], [0], [0], [1], [0, 0, 1, 1], [], []>} : vector<8x4xf32>, vector<4x8xf32>, vector<8x8xf32> -> vector<8x8xf32>
    %cst_111 = arith.constant dense<0.000000e+00> : vector<8x16xf32>
    %110 = tpu.matmul %109, %1, %cst_111 {dimension_numbers = #tpu.dot_dimension_numbers<[1], [0], [0], [1], [0, 0, 1, 1], [], []>} : vector<8x8xf32>, vector<8x16xf32>, vector<8x16xf32> -> vector<8x16xf32>
    %c15_112 = arith.constant 15 : index
    %c0_113 = arith.constant 0 : index
    %c0_114 = arith.constant 0 : index
    %111 = vector.load %arg4[%c15_112, %c0_113, %c0_114] : memref<16x8x16xf32, #tpu.memory_space<vmem>>, vector<1x8x16xf32>
    %112 = vector.shape_cast %111 : vector<1x8x16xf32> to vector<8x16xf32>
    %113 = vector.shape_cast %110 : vector<8x16xf32> to vector<1x8x16xf32>
    tpu.vector_store %arg4[%c15_112, %c0_113, %c0_114], %113 {strides = array<i32>} : memref<16x8x16xf32, #tpu.memory_space<vmem>>, vector<1x8x16xf32>,
    return
  }
  func.func @transform_0(%arg0: i32) -> (i32, i32, i32) {
    %c0_i32 = arith.constant 0 : i32
    %c0_i32_0 = arith.constant 0 : i32
    %c0_i32_1 = arith.constant 0 : i32
    return %arg0, %c0_i32, %c0_i32_0 : i32, i32, i32
  }
  func.func @transform_1(%arg0: i32) -> (i32, i32) {
    %c0_i32 = arith.constant 0 : i32
    %c0_i32_0 = arith.constant 0 : i32
    %c0_i32_1 = arith.constant 0 : i32
    return %c0_i32, %c0_i32_0 : i32, i32
  }
  func.func @transform_2(%arg0: i32) -> (i32, i32) {
    %c0_i32 = arith.constant 0 : i32
    %c0_i32_0 = arith.constant 0 : i32
    %c0_i32_1 = arith.constant 0 : i32
    return %c0_i32, %c0_i32_0 : i32, i32
  }
  func.func @transform_3(%arg0: i32) -> (i32, i32, i32) {
    %c0_i32 = arith.constant 0 : i32
    %c0_i32_0 = arith.constant 0 : i32
    %c0_i32_1 = arith.constant 0 : i32
    return %arg0, %c0_i32, %c0_i32_0 : i32, i32, i32
  }
}

module attributes {stable_mosaic.version = 11 : i64} {
  func.func @_linear_kernel(%arg0: i32, %arg1: memref<256x65xbf16, #tpu.memory_space<vmem>>, %arg2: memref<65x64xbf16, #tpu.memory_space<vmem>>, %arg3: memref<1x64xf32, #tpu.memory_space<vmem>>, %arg4: memref<256x64xf32, #tpu.memory_space<vmem>>) attributes {dimension_semantics = [#tpu.dimension_semantics<parallel>], iteration_bounds = array<i64: 1>, scalar_prefetch = 0 : i64, scratch_operands = 0 : i64, tpu.core_type = #tpu.core_type<tc>, window_params = [{transform_indices = @transform_0, window_bounds = array<i64: 256, 65>}, {pipeline_mode = #tpu.pipeline_mode<synchronous>, transform_indices = @transform_1, window_bounds = array<i64: 65, 64>}, {pipeline_mode = #tpu.pipeline_mode<synchronous>, transform_indices = @transform_2, window_bounds = array<i64: 1, 64>}, {transform_indices = @transform_3, window_bounds = array<i64: 256, 64>}]} {
    %c0 = arith.constant 0 : index
    %c0_0 = arith.constant 0 : index
    %0 = vector.load %arg1[%c0, %c0_0] : memref<256x65xbf16, #tpu.memory_space<vmem>>, vector<256x65xbf16>
    %c0_1 = arith.constant 0 : index
    %c0_2 = arith.constant 0 : index
    %1 = vector.load %arg2[%c0_1, %c0_2] : memref<65x64xbf16, #tpu.memory_space<vmem>>, vector<65x64xbf16>
    %cst = arith.constant dense<0.000000e+00> : vector<256x64xf32>
    %2 = tpu.matmul %0, %1, %cst {dimension_numbers = #tpu.dot_dimension_numbers<[1], [0], [0], [1], [0, 0, 1, 1], [], []>} : vector<256x65xbf16>, vector<65x64xbf16>, vector<256x64xf32> -> vector<256x64xf32>
    %c0_3 = arith.constant 0 : index
    %c0_4 = arith.constant 0 : index
    %3 = vector.load %arg3[%c0_3, %c0_4] : memref<1x64xf32, #tpu.memory_space<vmem>>, vector<1x64xf32>
    %4 = vector.broadcast %3 : vector<1x64xf32> to vector<256x64xf32>
    %5 = arith.addf %2, %4 : vector<256x64xf32>
    %c0_5 = arith.constant 0 : index
    %c0_6 = arith.constant 0 : index
    %6 = vector.load %arg4[%c0_5, %c0_6] : memref<256x64xf32, #tpu.memory_space<vmem>>, vector<256x64xf32>
    tpu.vector_store %arg4[%c0_5, %c0_6], %5 {strides = array<i32>} : memref<256x64xf32, #tpu.memory_space<vmem>>, vector<256x64xf32>,
    return
  }
  func.func @transform_0(%arg0: i32) -> (i32, i32) {
    %c0_i32 = arith.constant 0 : i32
    %c0_i32_0 = arith.constant 0 : i32
    return %arg0, %c0_i32 : i32, i32
  }
  func.func @transform_1(%arg0: i32) -> (i32, i32) {
    %c0_i32 = arith.constant 0 : i32
    %c0_i32_0 = arith.constant 0 : i32
    %c0_i32_1 = arith.constant 0 : i32
    return %c0_i32, %c0_i32_0 : i32, i32
  }
  func.func @transform_2(%arg0: i32) -> (i32, i32) {
    %c0_i32 = arith.constant 0 : i32
    %c0_i32_0 = arith.constant 0 : i32
    %c0_i32_1 = arith.constant 0 : i32
    return %c0_i32, %c0_i32_0 : i32, i32
  }
  func.func @transform_3(%arg0: i32) -> (i32, i32) {
    %c0_i32 = arith.constant 0 : i32
    %c0_i32_0 = arith.constant 0 : i32
    return %arg0, %c0_i32 : i32, i32
  }
}

</mosaic_0001>

<bundles_post_ra>
// kernel: forward.4
= control target key start
LH: loop header
LB: loop body
LE: loop exit
PB: predicated region body
PF: predicated region fallthrough
CT: control target
= control target key end

     0   :  { %vm864_vm0 = vcmask 523264   ;;  %s1784_s1 = inlined_call_operand.vmem [shape: bf16[768,64], index: 1, kind: input, shape index: {}]   ;;  %s1785_s2 = inlined_call_operand.vmem [shape: f32[1,64], index: 2, kind: input, shape index: {}]   ;;  %s1786_s0 = inlined_call_operand.vmem [shape: bf16[96,768], index: 0, kind: input, shape index: {}]   ;;  %s1787_s3 = inlined_call_operand.vmem [shape: f32[96,64], index: 3, kind: output, shape index: {}]  }
   0x1   :  { %v1260_v0 = vld [vmem:[%s1784_s1 + $0x38] sm:$0xff]  ;;  %v1259_v2 = vld [vmem:[%s1784_s1 + $0x30] sm:$0xff]  ;;  %v1258_v4 = vld [vmem:[%s1784_s1 + $0x28] sm:$0xff] }
   0x2   :  { %v1268_v1 = vld [vmem:[%s1784_s1 + $0x78] sm:$0xff]  ;;  %1301 = vmatpush.bf16.msra.mxu2 %v1260_v0  ;;  %v1267_v3 = vld [vmem:[%s1784_s1 + $0x70] sm:$0xff]  ;;  %618 = vmatpush.bf16.msra.mxu0 %v1260_v0  ;;  %v1266_v5 = vld [vmem:[%s1784_s1 + $0x68] sm:$0xff] }
   0x3   :  { %1309 = vmatpush.bf16.msra.mxu3 %v1268_v1  ;;  %657 = vmatpush.bf16.msra.mxu1 %v1268_v1  ;;  %v1257_v6 = vld [vmem:[%s1784_s1 + $0x20] sm:$0xff]  ;;  %v1256_v8 = vld [vmem:[%s1784_s1 + $0x18] sm:$0xff]  ;;  %v1255_v10 = vld [vmem:[%s1784_s1 + $0x10] sm:$0xff] }
   0x4   :  { %v1265_v7 = vld [vmem:[%s1784_s1 + $0x60] sm:$0xff]  ;;  %v1264_v9 = vld [vmem:[%s1784_s1 + $0x58] sm:$0xff]  ;;  %v1263_v11 = vld [vmem:[%s1784_s1 + $0x50] sm:$0xff] }
   0x5   :  { %v1254_v12 = vld [vmem:[%s1784_s1 + $0x8] sm:$0xff]  ;;  %v1253_v14 = vld [vmem:[%s1784_s1] sm:$0xff]  ;;  %v955_v16 = vld [vmem:[%s1786_s0 + $0x90] sm:$0xf] }
   0x6   :  { %1302 = vmatpush.bf16.msra.mxu2 %v1259_v2  ;;  %619 = vmatpush.bf16.msra.mxu0 %v1259_v2  ;;  %v1262_v13 = vld [vmem:[%s1784_s1 + $0x48] sm:$0xff]  ;;  %v1261_v15 = vld [vmem:[%s1784_s1 + $0x40] sm:$0xff]  ;;  %v1235_v18 = vld [vmem:[%s1786_s0 + $0x94] sm:$0xf] }
   0x7   :  { %1310 = vmatpush.bf16.msra.mxu3 %v1267_v3  ;;  %658 = vmatpush.bf16.msra.mxu1 %v1267_v3  ;;  %v1238_v17 = vld [vmem:[%s1786_s0 + $0xa4] sm:$0xf0]  ;;  %v957_v19 = vld [vmem:[%s1786_s0 + $0xa8] sm:$0xf0]  ;;  %v1276_v20 = vld [vmem:[%s1784_s1 + $0xb8] sm:$0xff] }
   0x8   :  { %v883_v21 = vld [vmem:[%s1786_s0] sm:$0xf]  ;;  %v1220_v22 = vld [vmem:[%s1786_s0 + $0x14] sm:$0xf0]  ;;  %v1217_v24 = vld [vmem:[%s1786_s0 + $0x4] sm:$0xf]  ;;  %v956_v26 = vor.u32 %v1238_v17, %v955_v16  ;;  %v960_v27 = vor.u32 %v1235_v18, %v957_v19 }
   0x9   :  { %v1284_v23 = vld [vmem:[%s1784_s1 + $0xf8] sm:$0xff]  ;;  %v884_v28 = vor.u32 %v1220_v22, %v883_v21  ;;  %v1275_v31 = vld [vmem:[%s1784_s1 + $0xb0] sm:$0xff]  ;;  %v1274_v35 = vld [vmem:[%s1784_s1 + $0xa8] sm:$0xff] }
   0xa   :  { %1303 = vmatpush.bf16.msra.mxu2 %v1258_v4  ;;  %620 = vmatpush.bf16.msra.mxu0 %v1258_v4  ;;  %v885_v25 = vld [vmem:[%s1786_s0 + $0x18] sm:$0xf0]  ;;  %v1283_v32 = vld [vmem:[%s1784_s1 + $0xf0] sm:$0xff]  ;;  %v1282_v36 = vld [vmem:[%s1784_s1 + $0xe8] sm:$0xff] }
   0xb   :  { %1311 = vmatpush.bf16.msra.mxu3 %v1266_v5  ;;  %659 = vmatpush.bf16.msra.mxu1 %v1266_v5  ;;  %v1300_v29 = vld [vmem:[%s1784_s1 + $0x178] sm:$0xff]  ;;  %v888_v30 = vor.u32 %v1217_v24, %v885_v25  ;;  %v1299_v34 = vld [vmem:[%s1784_s1 + $0x170] sm:$0xff]  ;;  %v1298_v38 = vld [vmem:[%s1784_s1 + $0x168] sm:$0xff] }
   0xc   :  { %v1292_v33 = vld [vmem:[%s1784_s1 + $0x138] sm:$0xff]  ;;  %v1291_v37 = vld [vmem:[%s1784_s1 + $0x130] sm:$0xff]  ;;  %v1273_v39 = vld [vmem:[%s1784_s1 + $0xa0] sm:$0xff] }
   0xd   :  { %v1281_v40 = vld [vmem:[%s1784_s1 + $0xe0] sm:$0xff]  ;;  %v1290_v41 = vld [vmem:[%s1784_s1 + $0x128] sm:$0xff]  ;;  %v1244_v43 = vld [vmem:[%s1786_s0 + $0xd4] sm:$0xf0] }
   0xe   :  { %1304 = vmatpush.bf16.msra.mxu2 %v1257_v6  ;;  %621 = vmatpush.bf16.msra.mxu0 %v1257_v6  ;;  %v979_v42 = vld [vmem:[%s1786_s0 + $0xc0] sm:$0xf]  ;;  %v1241_v44 = vld [vmem:[%s1786_s0 + $0xc4] sm:$0xf]  ;;  %v981_v45 = vld [vmem:[%s1786_s0 + $0xd8] sm:$0xf0] }
   0xf   :  { %1312 = vmatpush.bf16.msra.mxu3 %v1265_v7  ;;  %660 = vmatpush.bf16.msra.mxu1 %v1265_v7  ;;  %v907_v46 = vld [vmem:[%s1786_s0 + $0x30] sm:$0xf]  ;;  %v1297_v47 = vld [vmem:[%s1784_s1 + $0x160] sm:$0xff]  ;;  %v1226_v48 = vld [vmem:[%s1786_s0 + $0x44] sm:$0xf0]  ;;  %v980_v54 = vor.u32 %v1244_v43, %v979_v42  ;;  %v984_v55 = vor.u32 %v1241_v44, %v981_v45 }
  0x10   :  { %v1223_v49 = vld [vmem:[%s1786_s0 + $0x34] sm:$0xf]  ;;  %v1272_v50 = vld [vmem:[%s1784_s1 + $0x98] sm:$0xff]  ;;  %v909_v51 = vld [vmem:[%s1786_s0 + $0x48] sm:$0xf0]  ;;  %v908_v56 = vor.u32 %v1226_v48, %v907_v46 }
  0x11   :  { %v1280_v52 = vld [vmem:[%s1784_s1 + $0xd8] sm:$0xff]  ;;  %v1289_v53 = vld [vmem:[%s1784_s1 + $0x120] sm:$0xff]  ;;  %v912_v58 = vor.u32 %v1223_v49, %v909_v51  ;;  %v1271_v59 = vld [vmem:[%s1784_s1 + $0x90] sm:$0xff] }
  0x12   :  { %1305 = vmatpush.bf16.msra.mxu2 %v1256_v8  ;;  %622 = vmatpush.bf16.msra.mxu0 %v1256_v8  ;;  %v1296_v57 = vld [vmem:[%s1784_s1 + $0x158] sm:$0xff]  ;;  %v1279_v60 = vld [vmem:[%s1784_s1 + $0xd0] sm:$0xff]  ;;  %v1270_v63 = vld [vmem:[%s1784_s1 + $0x88] sm:$0xff] }
  0x13   :  { %1313 = vmatpush.bf16.msra.mxu3 %v1264_v9  ;;  %661 = vmatpush.bf16.msra.mxu1 %v1264_v9  ;;  %v1288_v61 = vld [vmem:[%s1784_s1 + $0x118] sm:$0xff]  ;;  %v1295_v62 = vld [vmem:[%s1784_s1 + $0x150] sm:$0xff]  ;;  %v1278_v0 = vld [vmem:[%s1784_s1 + $0xc8] sm:$0xff] }
  0x14   :  { %v1287_v1 = vld [vmem:[%s1784_s1 + $0x110] sm:$0xff]  ;;  %v1294_v2 = vld [vmem:[%s1784_s1 + $0x148] sm:$0xff]  ;;  %v1269_v3 = vld [vmem:[%s1784_s1 + $0x80] sm:$0xff] }
  0x15   :  { %v1286_v4 = vld [vmem:[%s1784_s1 + $0x108] sm:$0xff]  ;;  %v1277_v5 = vld [vmem:[%s1784_s1 + $0xc0] sm:$0xff]  ;;  %v1003_v6 = vld [vmem:[%s1786_s0 + $0xf0] sm:$0xf] }
  0x16   :  { %1306 = vmatpush.bf16.msra.mxu2 %v1255_v10  ;;  %623 = vmatpush.bf16.msra.mxu0 %v1255_v10  ;;  %v1250_v7 = vld [vmem:[%s1786_s0 + $0x104] sm:$0xf0]  ;;  %v1247_v8 = vld [vmem:[%s1786_s0 + $0xf4] sm:$0xf]  ;;  %v1005_v9 = vld [vmem:[%s1786_s0 + $0x108] sm:$0xf0] }
  0x17   :  { %1314 = vmatpush.bf16.msra.mxu3 %v1263_v11  ;;  %662 = vmatpush.bf16.msra.mxu1 %v1263_v11  ;;  %v1293_v10 = vld [vmem:[%s1784_s1 + $0x140] sm:$0xff]  ;;  %v1004_v16 = vor.u32 %v1250_v7, %v1003_v6  ;;  %v1008_v17 = vor.u32 %v1247_v8, %v1005_v9  ;;  %v1218_v22 = vld [vmem:[%s1786_s0 + $0xc] sm:$0xf]  ;;  %v899_v24 = vld [vmem:[%s1786_s0 + $0x10] sm:$0xf] }
  0x18   :  { %v931_v11 = vld [vmem:[%s1786_s0 + $0x60] sm:$0xf]  ;;  %v1222_v25 = vld [vmem:[%s1786_s0 + $0x24] sm:$0xf0]  ;;  %v1230_v46 = vld [vmem:[%s1786_s0 + $0x6c] sm:$0xf] }
  0x19   :  { %v1221_v21 = vld [vmem:[%s1786_s0 + $0x1c] sm:$0xf0]  ;;  %v939_v44 = vld [vmem:[%s1786_s0 + $0x68] sm:$0xf]  ;;  %v947_v48 = vld [vmem:[%s1786_s0 + $0x70] sm:$0xf] }
  0x1a   :  { %1307 = vmatpush.bf16.msra.mxu2 %v1254_v12  ;;  %624 = vmatpush.bf16.msra.mxu0 %v1254_v12  ;;  %v1232_v12 = vld [vmem:[%s1786_s0 + $0x74] sm:$0xf0]  ;;  %v1233_v45 = vld [vmem:[%s1786_s0 + $0x7c] sm:$0xf0]  ;;  %v1234_v49 = vld [vmem:[%s1786_s0 + $0x84] sm:$0xf0] }
  0x1b   :  { %1315 = vmatpush.bf16.msra.mxu3 %v1262_v13  ;;  %663 = vmatpush.bf16.msra.mxu1 %v1262_v13  ;;  %v1229_v13 = vld [vmem:[%s1786_s0 + $0x64] sm:$0xf]  ;;  %v932_v18 = vor.u32 %v1232_v12, %v931_v11  ;;  %v949_v51 = vld [vmem:[%s1786_s0 + $0x88] sm:$0xf0]  ;;  %v995_v8 = vld [vmem:[%s1786_s0 + $0xd0] sm:$0xf] }
  0x1c   :  { %v1242_v6 = vld [vmem:[%s1786_s0 + $0xcc] sm:$0xf]  ;;  %v989_v7 = vld [vmem:[%s1786_s0 + $0xe0] sm:$0xf0]  ;;  %v1246_v9 = vld [vmem:[%s1786_s0 + $0xe4] sm:$0xf0] }
  0x1d   :  { %v997_v11 = vld [vmem:[%s1786_s0 + $0xe8] sm:$0xf0] }
  0x1e   :  { %1308 = vmatpush.bf16.msra.mxu2 %v1253_v14  ;;  %625 = vmatpush.bf16.msra.mxu0 %v1253_v14  ;;  %v933_v14 = vld [vmem:[%s1786_s0 + $0x78] sm:$0xf0] }
  0x1f   :  { %1316 = vmatpush.bf16.msra.mxu3 %v1261_v15  ;;  %664 = vmatpush.bf16.msra.mxu1 %v1261_v15  ;;  %v1285_v15 = vld [vmem:[%s1784_s1 + $0x100] sm:$0xff]  ;;  %v936_v19 = vor.u32 %v1229_v13, %v933_v14  ;;  %v992_v13 = vor.u32 %v1242_v6, %v989_v7  ;;  %v996_v14 = vor.u32 %v1246_v9, %v995_v8 }
  0x21   :  { %641 = vmatmul.bf16.vlgmr.msra.gmra.mxu2 %v956_v26  ;;  %626 = vmatmul.bf16.vlgmr.msra.gmra.mxu0 %v884_v28  ;;  %v1219_v26 = vld [vmem:[%s1786_s0 + $0x14] sm:$0xf] }
  0x22   :  { %696 = vmatpush.bf16.msrb.mxu2 %v1276_v20  ;;  %680 = vmatmul.bf16.vlgmr.msra.gmra.mxu3 %v960_v27  ;;  %v891_v20 = vld [vmem:[%s1786_s0 + $0x8] sm:$0xf]  ;;  %v901_v27 = vld [vmem:[%s1786_s0 + $0x28] sm:$0xf0] }
  0x23   :  { %735 = vmatpush.bf16.msrb.mxu3 %v1284_v23  ;;  %813 = vmatpush.bf16.msrb.mxu1 %v1300_v29  ;;  %v893_v23 = vld [vmem:[%s1786_s0 + $0x20] sm:$0xf0]  ;;  %v892_v28 = vor.u32 %v1221_v21, %v891_v20  ;;  %v1019_v20 = vld [vmem:[%s1786_s0 + $0x100] sm:$0xf]  ;;  %v1252_v21 = vld [vmem:[%s1786_s0 + $0x114] sm:$0xf0] }
  0x24   :  { %665 = vmatmul.bf16.vlgmr.msra.gmra.mxu1 %v888_v30  ;;  %774 = vmatpush.bf16.msrb.mxu0 %v1292_v33  ;;  %v896_v29 = vor.u32 %v1218_v22, %v893_v23  ;;  %v900_v30 = vor.u32 %v1222_v25, %v899_v24  ;;  %v1227_v33 = vld [vmem:[%s1786_s0 + $0x4c] sm:$0xf0]  ;;  %v1249_v22 = vld [vmem:[%s1786_s0 + $0x104] sm:$0xf]  ;;  %v1021_v23 = vld [vmem:[%s1786_s0 + $0x118] sm:$0xf0] }
  0x26   :  { %697 = vmatpush.bf16.msrb.mxu2 %v1275_v31  ;;  %v904_v31 = vor.u32 %v1219_v26, %v901_v27  ;;  %v1020_v26 = vor.u32 %v1252_v21, %v1019_v20 }
  0x27   :  { %736 = vmatpush.bf16.msrb.mxu3 %v1283_v32  ;;  %814 = vmatpush.bf16.msrb.mxu1 %v1299_v34  ;;  %v915_v32 = vld [vmem:[%s1786_s0 + $0x38] sm:$0xf]  ;;  %v1224_v34 = vld [vmem:[%s1786_s0 + $0x3c] sm:$0xf] }
  0x28   :  { %775 = vmatpush.bf16.msrb.mxu0 %v1291_v37  ;;  %v1228_v37 = vld [vmem:[%s1786_s0 + $0x54] sm:$0xf0] }
  0x2a   :  { %698 = vmatpush.bf16.msrb.mxu2 %v1274_v35  ;;  %v917_v35 = vld [vmem:[%s1786_s0 + $0x50] sm:$0xf0] }
  0x2b   :  { %737 = vmatpush.bf16.msrb.mxu3 %v1282_v36  ;;  %815 = vmatpush.bf16.msrb.mxu1 %v1298_v38  ;;  %v923_v36 = vld [vmem:[%s1786_s0 + $0x40] sm:$0xf]  ;;  %v1225_v38 = vld [vmem:[%s1786_s0 + $0x44] sm:$0xf] }
  0x2c   :  { %776 = vmatpush.bf16.msrb.mxu0 %v1290_v41  ;;  %v920_v41 = vor.u32 %v1224_v34, %v917_v35  ;;  %v924_v42 = vor.u32 %v1228_v37, %v923_v36 }
  0x2e   :  { %699 = vmatpush.bf16.msrb.mxu2 %v1273_v39  ;;  %v925_v39 = vld [vmem:[%s1786_s0 + $0x58] sm:$0xf0] }
  0x2f   :  { %738 = vmatpush.bf16.msrb.mxu3 %v1281_v40  ;;  %816 = vmatpush.bf16.msrb.mxu1 %v1297_v47  ;;  %v916_v40 = vor.u32 %v1227_v33, %v915_v32  ;;  %v928_v43 = vor.u32 %v1225_v38, %v925_v39  ;;  %v941_v47 = vld [vmem:[%s1786_s0 + $0x80] sm:$0xf0] }
  0x30   :  { %777 = vmatpush.bf16.msrb.mxu0 %v1289_v53  ;;  %v944_v53 = vor.u32 %v1230_v46, %v941_v47 }
  0x31   :  { %646 = vmatmul.bf16.gmra.mxu2 %v980_v54  ;;  %631 = vmatmul.bf16.gmra.mxu0 %v908_v56  ;;  %v948_v54 = vor.u32 %v1234_v49, %v947_v48  ;;  %v963_v56 = vld [vmem:[%s1786_s0 + $0x98] sm:$0xf] }
  0x32   :  { %700 = vmatpush.bf16.msrb.mxu2 %v1272_v50  ;;  %685 = vmatmul.bf16.gmra.mxu3 %v984_v55  ;;  %v1231_v50 = vld [vmem:[%s1786_s0 + $0x74] sm:$0xf] }
  0x33   :  { %739 = vmatpush.bf16.msrb.mxu3 %v1280_v52  ;;  %817 = vmatpush.bf16.msrb.mxu1 %v1296_v57  ;;  %v940_v52 = vor.u32 %v1233_v45, %v939_v44  ;;  %v952_v55 = vor.u32 %v1231_v50, %v949_v51  ;;  %v1239_v57 = vld [vmem:[%s1786_s0 + $0xac] sm:$0xf0] }
  0x34   :  { %670 = vmatmul.bf16.gmra.mxu1 %v912_v58  ;;  %778 = vmatpush.bf16.msrb.mxu0 %v1288_v61  ;;  %v1236_v58 = vld [vmem:[%s1786_s0 + $0x9c] sm:$0xf]  ;;  %v1240_v61 = vld [vmem:[%s1786_s0 + $0xb4] sm:$0xf0] }
  0x36   :  { %701 = vmatpush.bf16.msrb.mxu2 %v1271_v59  ;;  %v965_v59 = vld [vmem:[%s1786_s0 + $0xb0] sm:$0xf0] }
  0x37   :  { %740 = vmatpush.bf16.msrb.mxu3 %v1279_v60  ;;  %818 = vmatpush.bf16.msrb.mxu1 %v1295_v62  ;;  %v971_v60 = vld [vmem:[%s1786_s0 + $0xa0] sm:$0xf]  ;;  %v1237_v62 = vld [vmem:[%s1786_s0 + $0xa4] sm:$0xf] }
  0x38   :  { %779 = vmatpush.bf16.msrb.mxu0 %v1287_v1  ;;  %v968_v1 = vor.u32 %v1236_v58, %v965_v59 }
  0x3a   :  { %702 = vmatpush.bf16.msrb.mxu2 %v1270_v63  ;;  %v973_v63 = vld [vmem:[%s1786_s0 + $0xb8] sm:$0xf0] }
  0x3b   :  { %741 = vmatpush.bf16.msrb.mxu3 %v1278_v0  ;;  %819 = vmatpush.bf16.msrb.mxu1 %v1294_v2  ;;  %v964_v0 = vor.u32 %v1239_v57, %v963_v56  ;;  %v972_v2 = vor.u32 %v1240_v61, %v971_v60 }
  0x3c   :  { %780 = vmatpush.bf16.msrb.mxu0 %v1286_v4  ;;  %v987_v4 = vld [vmem:[%s1786_s0 + $0xc8] sm:$0xf] }
  0x3e   :  { %703 = vmatpush.bf16.msrb.mxu2 %v1269_v3  ;;  %v976_v3 = vor.u32 %v1237_v62, %v973_v63 }
  0x3f   :  { %742 = vmatpush.bf16.msrb.mxu3 %v1277_v5  ;;  %820 = vmatpush.bf16.msrb.mxu1 %v1293_v10  ;;  %v1245_v5 = vld [vmem:[%s1786_s0 + $0xdc] sm:$0xf0]  ;;  %v1243_v10 = vld [vmem:[%s1786_s0 + $0xd4] sm:$0xf] }
  0x40   :  { %781 = vmatpush.bf16.msrb.mxu0 %v1285_v15  ;;  %v988_v12 = vor.u32 %v1245_v5, %v987_v4  ;;  %v1000_v15 = vor.u32 %v1243_v10, %v997_v11 }
  0x41   :  { %651 = vmatmul.bf16.gmra.mxu2 %v1004_v16  ;;  %636 = vmatmul.bf16.gmra.mxu0 %v932_v18  ;;  %v1011_v16 = vld [vmem:[%s1786_s0 + $0xf8] sm:$0xf]  ;;  %v1248_v18 = vld [vmem:[%s1786_s0 + $0xfc] sm:$0xf] }
  0x42   :  { %690 = vmatmul.bf16.gmra.mxu3 %v1008_v17  ;;  %v1251_v17 = vld [vmem:[%s1786_s0 + $0x10c] sm:$0xf0] }
  0x43   :  { %v1012_v24 = vor.u32 %v1251_v17, %v1011_v16 }
  0x44   :  { %675 = vmatmul.bf16.gmra.mxu1 %v936_v19  ;;  %v1013_v19 = vld [vmem:[%s1786_s0 + $0x110] sm:$0xf0] }
  0x45   :  { %v1016_v25 = vor.u32 %v1248_v18, %v1013_v19 }
  0x51   :  { %704 = vmatmul.bf16.vlgmr.msrb.gmra.mxu2 %v892_v28  ;;  %782 = vmatmul.bf16.vlgmr.msrb.gmra.mxu0 %v900_v30  ;;  %v1024_v28 = vor.u32 %v1249_v22, %v1021_v23  ;;  %v1701_v30 = vld [vmem:[%s1785_s2] ss:$0 sm:$0xff] }
  0x52   :  { %743 = vmatmul.bf16.vlgmr.msrb.gmra.mxu3 %v896_v29 }
  0x54   :  { %821 = vmatmul.bf16.vlgmr.msrb.gmra.mxu1 %v904_v31 }
  0x61   :  { %709 = vmatmul.bf16.gmra.mxu2 %v916_v40  ;;  %787 = vmatmul.bf16.gmra.mxu0 %v924_v42 }
  0x62   :  { %748 = vmatmul.bf16.gmra.mxu3 %v920_v41 }
  0x64   :  { %826 = vmatmul.bf16.gmra.mxu1 %v928_v43 }
  0x71   :  { %714 = vmatmul.bf16.gmra.mxu2 %v940_v52  ;;  %792 = vmatmul.bf16.gmra.mxu0 %v948_v54 }
  0x72   :  { %753 = vmatmul.bf16.gmra.mxu3 %v944_v53 }
  0x74   :  { %831 = vmatmul.bf16.gmra.mxu1 %v952_v55 }
  0x81   :  { %719 = vmatmul.bf16.gmra.mxu2 %v964_v0  ;;  %797 = vmatmul.bf16.gmra.mxu0 %v972_v2 }
  0x82   :  { %758 = vmatmul.bf16.gmra.mxu3 %v968_v1 }
  0x84   :  { %836 = vmatmul.bf16.gmra.mxu1 %v976_v3 }
  0x91   :  { %724 = vmatmul.bf16.gmra.mxu2 %v988_v12  ;;  %802 = vmatmul.bf16.gmra.mxu0 %v996_v14 }
  0x92   :  { %763 = vmatmul.bf16.gmra.mxu3 %v992_v13 }
  0x94   :  { %841 = vmatmul.bf16.gmra.mxu1 %v1000_v15 }
  0x9e   :  { %v627_v27 = vpop.f32.mrf.mxu0 }
  0x9f   :  { %v628_v0 = vadd.f32 %v1701_v30, %v627_v27 }
  0xa1   :  { %v666_v29 = vpop.f32.mrf.mxu1  ;;  %729 = vmatmul.bf16.gmra.mxu2 %v1012_v24  ;;  %807 = vmatmul.bf16.gmra.mxu0 %v1020_v26 }
  0xa2   :  { %768 = vmatmul.bf16.gmra.mxu3 %v1016_v25  ;;  %v667_v4 = vadd.f32 %v666_v29, %v628_v0 }
  0xa4   :  { %846 = vmatmul.bf16.gmra.mxu1 %v1024_v28  ;;  %v642_v31 = vpop.f32.mrf.mxu2 }
  0xa5   :  { %v681_v32 = vpop.f32.mrf.mxu3  ;;  %v643_v33 = vadd.f32 %v1701_v30, %v642_v31 }
  0xa6   :  { %v629_v35 = vpop.f32.mrf.mxu0 }
  0xa7   :  { %v1704_v34 = vadd.f32 %v681_v32, %v643_v33  ;;  %v630_v8 = vadd.f32 %v1701_v30, %v629_v35 }
  0xa9   :  { %v668_v36 = vpop.f32.mrf.mxu1 }
  0xaa   :  { %v669_v13 = vadd.f32 %v668_v36, %v630_v8 }
  0xac   :  { %v644_v37 = vpop.f32.mrf.mxu2 }
  0xad   :  { %v683_v38 = vpop.f32.mrf.mxu3  ;;  %v645_v39 = vadd.f32 %v1701_v30, %v644_v37 }
  0xae   :  { %v632_v41 = vpop.f32.mrf.mxu0 }
  0xaf   :  { %v1707_v40 = vadd.f32 %v683_v38, %v645_v39  ;;  %v633_v19 = vadd.f32 %v1701_v30, %v632_v41 }
  0xb1   :  { %v671_v42 = vpop.f32.mrf.mxu1 }
  0xb2   :  { %v672_v24 = vadd.f32 %v671_v42, %v633_v19 }
  0xb4   :  { %v647_v43 = vpop.f32.mrf.mxu2 }
  0xb5   :  { %v686_v44 = vpop.f32.mrf.mxu3  ;;  %v648_v45 = vadd.f32 %v1701_v30, %v647_v43 }
  0xb6   :  { %v634_v47 = vpop.f32.mrf.mxu0 }
  0xb7   :  { %v1710_v46 = vadd.f32 %v686_v44, %v648_v45  ;;  %v635_v31 = vadd.f32 %v1701_v30, %v634_v47 }
  0xb9   :  { %v673_v48 = vpop.f32.mrf.mxu1 }
  0xba   :  { %v674_v37 = vadd.f32 %v673_v48, %v635_v31 }
  0xbc   :  { %v649_v49 = vpop.f32.mrf.mxu2 }
  0xbd   :  { %v688_v50 = vpop.f32.mrf.mxu3  ;;  %v650_v51 = vadd.f32 %v1701_v30, %v649_v49 }
  0xbe   :  { %v637_v53 = vpop.f32.mrf.mxu0 }
  0xbf   :  { %v1713_v52 = vadd.f32 %v688_v50, %v650_v51  ;;  %v638_v44 = vadd.f32 %v1701_v30, %v637_v53 }
  0xc1   :  { %v676_v54 = vpop.f32.mrf.mxu1 }
  0xc2   :  { %v677_v51 = vadd.f32 %v676_v54, %v638_v44 }
  0xc4   :  { %v652_v55 = vpop.f32.mrf.mxu2 }
  0xc5   :  { %v691_v56 = vpop.f32.mrf.mxu3  ;;  %v653_v57 = vadd.f32 %v1701_v30, %v652_v55 }
  0xc6   :  { %v639_v59 = vpop.f32.mrf.mxu0 }
  0xc7   :  { %v1716_v58 = vadd.f32 %v691_v56, %v653_v57 }
  0xc9   :  { %v1718_v60 = vpop.f32.mrf.mxu1 }
  0xcc   :  { %v654_v61 = vpop.f32.mrf.mxu2 }
  0xcd   :  { %v693_v62 = vpop.f32.mrf.mxu3  ;;  %v655_v63 = vadd.f32 %v1701_v30, %v654_v61 }
  0xce   :  { %v783_v2 = vpop.f32.mrf.mxu0 }
  0xcf   :  { %v1722_v1 = vadd.f32 %v693_v62, %v655_v63  ;;  %v640_v62 = vadd.f32 %v1701_v30, %v639_v59 }
  0xd1   :  { %v822_v3 = vpop.f32.mrf.mxu1 }
  0xd4   :  { %v705_v5 = vpop.f32.mrf.mxu2 }
  0xd5   :  { %v744_v6 = vpop.f32.mrf.mxu3  ;;  %v706_v7 = vadd.f32 %v705_v5, %v667_v4 }
  0xd6   :  { %v785_v10 = vpop.f32.mrf.mxu0 }
  0xd7   :  { %v745_v9 = vadd.f32 %v744_v6, %v706_v7 }
  0xd9   :  { %v824_v11 = vpop.f32.mrf.mxu1  ;;  %v784_v12 = vadd.f32 %v783_v2, %v745_v9 }
  0xdb   :  { %v823_v14 = vadd.f32 %v822_v3, %v784_v12  ;;  %v679_v3 = vadd.f32 %v1718_v60, %v640_v62 }
  0xdc   :  { %v707_v15 = vpop.f32.mrf.mxu2 }
  0xdd   :  { %v746_v16 = vpop.f32.mrf.mxu3  ;;  %v852_v17 = vmax.f32 %v823_v14, 0.0  ;;  %v708_v18 = vadd.f32 %v707_v15, %v669_v13 }
  0xde   :  { %v788_v21 = vpop.f32.mrf.mxu0 }
  0xdf   :  { %865 = vst.msk [vmem:[%s1787_s3] sm:$0xff] %vm864_vm0, %v852_v17  ;;  %v747_v20 = vadd.f32 %v746_v16, %v708_v18 }
  0xe1   :  { %v827_v22 = vpop.f32.mrf.mxu1  ;;  %v786_v23 = vadd.f32 %v785_v10, %v747_v20 }
  0xe3   :  { %v825_v25 = vadd.f32 %v824_v11, %v786_v23 }
  0xe4   :  { %v710_v26 = vpop.f32.mrf.mxu2 }
  0xe5   :  { %v749_v27 = vpop.f32.mrf.mxu3  ;;  %v853_v28 = vmax.f32 %v825_v25, 0.0  ;;  %v711_v29 = vadd.f32 %v710_v26, %v672_v24 }
  0xe6   :  { %v790_v33 = vpop.f32.mrf.mxu0 }
  0xe7   :  { %866 = vst.msk [vmem:[%s1787_s3 + $0x8] sm:$0xff] %vm864_vm0, %v853_v28  ;;  %v750_v32 = vadd.f32 %v749_v27, %v711_v29 }
  0xe9   :  { %v829_v35 = vpop.f32.mrf.mxu1  ;;  %v789_v36 = vadd.f32 %v788_v21, %v750_v32 }
  0xeb   :  { %v828_v38 = vadd.f32 %v827_v22, %v789_v36 }
  0xec   :  { %v712_v39 = vpop.f32.mrf.mxu2 }
  0xed   :  { %v751_v41 = vpop.f32.mrf.mxu3  ;;  %v854_v42 = vmax.f32 %v828_v38, 0.0  ;;  %v713_v43 = vadd.f32 %v712_v39, %v674_v37 }
  0xee   :  { %v793_v47 = vpop.f32.mrf.mxu0 }
  0xef   :  { %867 = vst.msk [vmem:[%s1787_s3 + $0x10] sm:$0xff] %vm864_vm0, %v854_v42  ;;  %v752_v45 = vadd.f32 %v751_v41, %v713_v43 }
  0xf1   :  { %v832_v49 = vpop.f32.mrf.mxu1  ;;  %v791_v50 = vadd.f32 %v790_v33, %v752_v45 }
  0xf3   :  { %v830_v55 = vadd.f32 %v829_v35, %v791_v50 }
  0xf4   :  { %v715_v56 = vpop.f32.mrf.mxu2 }
  0xf5   :  { %v754_v48 = vpop.f32.mrf.mxu3  ;;  %v855_v57 = vmax.f32 %v830_v55, 0.0  ;;  %v716_v61 = vadd.f32 %v715_v56, %v677_v51 }
  0xf6   :  { %v795_v63 = vpop.f32.mrf.mxu0 }
  0xf7   :  { %868 = vst.msk [vmem:[%s1787_s3 + $0x18] sm:$0xff] %vm864_vm0, %v855_v57  ;;  %v755_v53 = vadd.f32 %v754_v48, %v716_v61 }
  0xf9   :  { %v834_v0 = vpop.f32.mrf.mxu1  ;;  %v794_v2 = vadd.f32 %v793_v47, %v755_v53 }
  0xfb   :  { %v833_v4 = vadd.f32 %v832_v49, %v794_v2 }
  0xfc   :  { %v717_v54 = vpop.f32.mrf.mxu2 }
  0xfd   :  { %v756_v5 = vpop.f32.mrf.mxu3  ;;  %v856_v6 = vmax.f32 %v833_v4, 0.0  ;;  %v718_v7 = vadd.f32 %v717_v54, %v679_v3 }
  0xfe   :  { %v798_v59 = vpop.f32.mrf.mxu0 }
  0xff   :  { %869 = vst.msk [vmem:[%s1787_s3 + $0x20] sm:$0xff] %vm864_vm0, %v856_v6  ;;  %v757_v30 = vadd.f32 %v756_v5, %v718_v7 }
 0x101   :  { %v837_v8 = vpop.f32.mrf.mxu1  ;;  %v796_v9 = vadd.f32 %v795_v63, %v757_v30 }
 0x103   :  { %v835_v10 = vadd.f32 %v834_v0, %v796_v9 }
 0x104   :  { %v720_v11 = vpop.f32.mrf.mxu2 }
 0x105   :  { %v759_v12 = vpop.f32.mrf.mxu3  ;;  %v857_v13 = vmax.f32 %v835_v10, 0.0  ;;  %v721_v60 = vadd.f32 %v720_v11, %v1704_v34 }
 0x106   :  { %v800_v15 = vpop.f32.mrf.mxu0 }
 0x107   :  { %870 = vst.msk [vmem:[%s1787_s3 + $0x28] sm:$0xff] %vm864_vm0, %v857_v13  ;;  %v760_v14 = vadd.f32 %v759_v12, %v721_v60 }
 0x109   :  { %v799_v16 = vadd.f32 %v798_v59, %v760_v14  ;;  %v839_v17 = vpop.f32.mrf.mxu1 }
 0x10b   :  { %v838_v18 = vadd.f32 %v837_v8, %v799_v16 }
 0x10c   :  { %v722_v19 = vpop.f32.mrf.mxu2 }
 0x10d   :  { %v761_v20 = vpop.f32.mrf.mxu3  ;;  %v858_v21 = vmax.f32 %v838_v18, 0.0  ;;  %v723_v22 = vadd.f32 %v722_v19, %v1707_v40 }
 0x10e   :  { %v803_v24 = vpop.f32.mrf.mxu0 }
 0x10f   :  { %871 = vst.msk [vmem:[%s1787_s3 + $0x30] sm:$0xff] %vm864_vm0, %v858_v21  ;;  %v762_v34 = vadd.f32 %v761_v20, %v723_v22 }
 0x111   :  { %v801_v23 = vadd.f32 %v800_v15, %v762_v34  ;;  %v842_v26 = vpop.f32.mrf.mxu1 }
 0x113   :  { %v840_v25 = vadd.f32 %v839_v17, %v801_v23 }
 0x114   :  { %v725_v27 = vpop.f32.mrf.mxu2 }
 0x115   :  { %v764_v28 = vpop.f32.mrf.mxu3  ;;  %v859_v29 = vmax.f32 %v840_v25, 0.0  ;;  %v726_v31 = vadd.f32 %v725_v27, %v1710_v46 }
 0x116   :  { %v805_v35 = vpop.f32.mrf.mxu0 }
 0x117   :  { %872 = vst.msk [vmem:[%s1787_s3 + $0x38] sm:$0xff] %vm864_vm0, %v859_v29  ;;  %v765_v40 = vadd.f32 %v764_v28, %v726_v31 }
 0x119   :  { %v804_v32 = vadd.f32 %v803_v24, %v765_v40  ;;  %v844_v41 = vpop.f32.mrf.mxu1 }
 0x11b   :  { %v843_v33 = vadd.f32 %v842_v26, %v804_v32 }
 0x11c   :  { %v727_v36 = vpop.f32.mrf.mxu2 }
 0x11d   :  { %v766_v37 = vpop.f32.mrf.mxu3  ;;  %v860_v38 = vmax.f32 %v843_v33, 0.0  ;;  %v728_v39 = vadd.f32 %v727_v36, %v1713_v52 }
 0x11e   :  { %v808_v50 = vpop.f32.mrf.mxu0 }
 0x11f   :  { %873 = vst.msk [vmem:[%s1787_s3 + $0x40] sm:$0xff] %vm864_vm0, %v860_v38  ;;  %v767_v46 = vadd.f32 %v766_v37, %v728_v39 }
 0x121   :  { %v806_v42 = vadd.f32 %v805_v35, %v767_v46  ;;  %v847_v51 = vpop.f32.mrf.mxu1 }
 0x123   :  { %v845_v43 = vadd.f32 %v844_v41, %v806_v42 }
 0x124   :  { %v730_v44 = vpop.f32.mrf.mxu2 }
 0x125   :  { %v769_v45 = vpop.f32.mrf.mxu3  ;;  %v861_v47 = vmax.f32 %v845_v43, 0.0  ;;  %v731_v49 = vadd.f32 %v730_v44, %v1716_v58 }
 0x126   :  { %v810_v53 = vpop.f32.mrf.mxu0 }
 0x127   :  { %874 = vst.msk [vmem:[%s1787_s3 + $0x48] sm:$0xff] %vm864_vm0, %v861_v47  ;;  %v770_v52 = vadd.f32 %v769_v45, %v731_v49 }
 0x129   :  { %v809_v55 = vadd.f32 %v808_v50, %v770_v52  ;;  %v849_v0 = vpop.f32.mrf.mxu1 }
 0x12b   :  { %v848_v56 = vadd.f32 %v847_v51, %v809_v55 }
 0x12c   :  { %v732_v48 = vpop.f32.mrf.mxu2 }
 0x12d   :  { %v862_v57 = vmax.f32 %v848_v56, 0.0  ;;  %v733_v61 = vadd.f32 %v732_v48, %v1722_v1  ;;  %v771_v62 = vpop.f32.mrf.mxu3 }
 0x12f   :  { %875 = vst.msk [vmem:[%s1787_s3 + $0x50] sm:$0xff] %vm864_vm0, %v862_v57  ;;  %v772_v58 = vadd.f32 %v771_v62, %v733_v61 }
 0x131   :  { %v811_v63 = vadd.f32 %v810_v53, %v772_v58 }
 0x133   :  { %v850_v2 = vadd.f32 %v849_v0, %v811_v63 }
 0x135   :  { %v863_v3 = vmax.f32 %v850_v2, 0.0 }
 0x137   :  { %876 = vst.msk [vmem:[%s1787_s3 + $0x58] sm:$0xff] %vm864_vm0, %v863_v3 }

// kernel: forward.5
= control target key start
LH: loop header
LB: loop body
LE: loop exit
PB: predicated region body
PF: predicated region fallthrough
CT: control target
= control target key end

     0   :  { %s1047_s18 = smov 0   ;;  %s1049_s19 = smov 0   ;;  %s1380_s0 = inlined_call_operand.vmem [shape: bf16[6,128,8], index: 0, kind: input, shape index: {}]   ;;  %s1381_s1 = inlined_call_operand.vmem [shape: bf16[6,8,32], index: 1, kind: input, shape index: {}]   ;;  %s1382_s2 = inlined_call_operand.vmem [shape: f32[6,1,32], index: 2, kind: input, shape index: {}, may-alias: {2,4}]   ;;  %s1383_s3 = inlined_call_operand.vmem [shape: bf16[6,32,32], index: 3, kind: input, shape index: {}]   ;;  %s1384_s4 = inlined_call_operand.vmem [shape: f32[6,1,32], index: 4, kind: input, shape index: {}, may-alias: {2,4}]   ;;  %s1385_s5 = inlined_call_operand.vmem [shape: f32[128,32], index: 5, kind: output, shape index: {}]  }
   0x1   :  { %s1051_s20 = smov 0  }
   0x2 LB: > { %s27_s21 = sadd.s32 1, %s1009_s19  ;;  %p882_p0 = scmp.ge.s32.totalorder %s1013_s20, 1  ;;  %s1013_s20 = sphi %s1051_s20, %s15_s20   ;;  %s1009_s19 = sphi %s1049_s19, %s1387_s19   ;;  %s1005_s18 = sphi %s1047_s18, %s1386_s18  }
   0x3   : > { %p29_p1 = scmp.ge.s32.totalorder %s27_s21, 6  ;;  %p246_p2 = scmp.lt.s32.totalorder %s1013_s20, 7 }
   0x5   : > { %s1389_s21 = smov (%p29_p1, %s27_s21), 0  ;;  %p247_p3 = pnand %p882_p0, %p246_p2 }
   0x6   : > { %p294_p4 = scmp.lt.s32.totalorder (!%p247_p3), %s1005_s18, 5  ;;  %p326_p5 = scmp.eq.s32.totalorder (!%p247_p3), %s1005_s18, 0 }
   0x7   : > { %250 = sbr.rel (%p247_p3) target bundleno = 446 (0x1be), region = 40 }
   0xc   : > { %s1391_s18 = smov (!%p294_p4, %s1005_s18), 5  ;;  %331 = sbr.rel (!%p326_p5) target bundleno = 29 (0x1d), region = 44  ;;  %vm332_vm0 = vcmask (%p326_p5), 261120   ;;  %v1015_v0 = vmov (%p326_p5), 0.0  }
   0xd   : > { %s947_s22 = sshll.u32 %s1391_s18, 6  ;;  %s885_s23 = sshll.u32 %s1391_s18, 2  ;;  %333 = vst.msk [vmem:[%s1385_s5] sm:$0xff] (%p326_p5), %vm332_vm0, %v1015_v0 }
   0xe   : > { %s1072_s26 = scalar_lea.vmem %s1380_s0, %s947_s22  ;;  %s305_s29 = scalar_lea.vmem %s1381_s1, %s885_s23  ;;  %334 = vst.msk [vmem:[%s1385_s5 + $0x8] sm:$0xff] (%p326_p5), %vm332_vm0, %v1015_v0 }
   0xf   : > { %s311_s7 = scalar_lea.vmem %s1382_s2, %s1391_s18  ;;  %s948_s8 = sshll.u32 %s1391_s18, 4  ;;  %335 = vst.msk [vmem:[%s1385_s5 + $0x10] sm:$0xff] (%p326_p5), %vm332_vm0, %v1015_v0 }
  0x10   : > { %s1085_s11 = scalar_lea.vmem %s1383_s3, %s948_s8  ;;  %s324_s14 = scalar_lea.vmem %s1384_s4, %s1391_s18  ;;  %336 = vst.msk [vmem:[%s1385_s5 + $0x18] sm:$0xff] (%p326_p5), %vm332_vm0, %v1015_v0 }
  0x11   : > { %337 = vst.msk [vmem:[%s1385_s5 + $0x20] sm:$0xff] %vm332_vm0, %v1015_v0 }
  0x12   : > { %338 = vst.msk [vmem:[%s1385_s5 + $0x28] sm:$0xff] %vm332_vm0, %v1015_v0 }
  0x13   : > { %339 = vst.msk [vmem:[%s1385_s5 + $0x30] sm:$0xff] %vm332_vm0, %v1015_v0 }
  0x14   : > { %340 = vst.msk [vmem:[%s1385_s5 + $0x38] sm:$0xff] %vm332_vm0, %v1015_v0 }
  0x15   : > { %341 = vst.msk [vmem:[%s1385_s5 + $0x40] sm:$0xff] %vm332_vm0, %v1015_v0 }
  0x16   : > { %342 = vst.msk [vmem:[%s1385_s5 + $0x48] sm:$0xff] %vm332_vm0, %v1015_v0 }
  0x17   : > { %343 = vst.msk [vmem:[%s1385_s5 + $0x50] sm:$0xff] %vm332_vm0, %v1015_v0 }
  0x18   : > { %344 = vst.msk [vmem:[%s1385_s5 + $0x58] sm:$0xff] %vm332_vm0, %v1015_v0 }
  0x19   : > { %345 = vst.msk [vmem:[%s1385_s5 + $0x60] sm:$0xff] %vm332_vm0, %v1015_v0 }
  0x1a   : > { %346 = vst.msk [vmem:[%s1385_s5 + $0x68] sm:$0xff] %vm332_vm0, %v1015_v0 }
  0x1b   : > { %347 = vst.msk [vmem:[%s1385_s5 + $0x70] sm:$0xff] %vm332_vm0, %v1015_v0 }
  0x1c   : > { %348 = vst.msk [vmem:[%s1385_s5 + $0x78] sm:$0xff] %vm332_vm0, %v1015_v0 }
  0x1d PF: > { %v385_v1 = vld [vmem:[%s305_s29] sm:$0xf]  ;;  %vm455_vm1 = vcmask 1043456   ;;  %vm430_vm2 = vcmask 64512   ;;  %v951_v4 = vld [vmem:[%s1072_s26 + $0x8] sm:$0xff]  ;;  %v952_v5 = vld [vmem:[%s1072_s26 + $0x10] sm:$0xff] }
  0x1e   : > { %v457_v2 = vsel %vm455_vm1, %v385_v1, 0  ;;  %v950_v3 = vld [vmem:[%s1072_s26] sm:$0xff]  ;;  %v955_v6 = vld [vmem:[%s1072_s26 + $0x28] sm:$0xff]  ;;  %v953_v7 = vld [vmem:[%s1072_s26 + $0x18] sm:$0xff]  ;;  %vm352_vm3 = vcmask 261120   ;;  %v1016_v58 = vmov 0.0  }
  0x1f   : > { %466 = vmatpush.bf16.msra.mxu0 %v457_v2  ;;  %960 = vmatpush.bf16.msra.mxu3 %v457_v2  ;;  %v956_v8 = vld [vmem:[%s1072_s26 + $0x30] sm:$0xff]  ;;  %v954_v9 = vld [vmem:[%s1072_s26 + $0x20] sm:$0xff]  ;;  %v957_v10 = vld [vmem:[%s1072_s26 + $0x38] sm:$0xff]  ;;  %353 = vst.msk [vmem:[#allocation2] sm:$0xff] %vm352_vm3, %v1016_v58 }
  0x20   : > { %v959_v11 = vld [vmem:[%s1085_s11 + $0x8] sm:$0xff]  ;;  %v958_v12 = vld [vmem:[%s1085_s11] sm:$0xff]  ;;  %354 = vst.msk [vmem:[#allocation2 + $0x8] sm:$0xff] %vm352_vm3, %v1016_v58 }
  0x21   : > { %595 = vmatpush.bf16.msra.mxu1 %v959_v11  ;;  %961 = vmatpush.bf16.msra.mxu2 %v959_v11  ;;  %v1178_v14 = vld [vmem:[%s311_s7] ss:$0 sm:$0xff]  ;;  %355 = vst.msk [vmem:[#allocation2 + $0x10] sm:$0xff] %vm352_vm3, %v1016_v58 }
  0x22   : > { %921 = vmatmul.msk.bf16.vlgmr.msra.gmra.mxu0 %vm430_vm2, %v950_v3  ;;  %926 = vmatmul.msk.bf16.vlgmr.msra.gmra.mxu3 %vm430_vm2, %v955_v6  ;;  %356 = vst.msk [vmem:[#allocation2 + $0x18] sm:$0xff] %vm352_vm3, %v1016_v58  ;;  %v1226_v11 = vld [vmem:[%s324_s14] ss:$0 sm:$0xff] }
  0x23   : > { %357 = vst.msk [vmem:[#allocation2 + $0x20] sm:$0xff] %vm352_vm3, %v1016_v58 }
  0x24   : > { %358 = vst.msk [vmem:[#allocation2 + $0x28] sm:$0xff] %vm352_vm3, %v1016_v58 }
  0x25   : > { %596 = vmatpush.bf16.msra.mxu1 %v958_v12  ;;  %962 = vmatpush.bf16.msra.mxu2 %v958_v12  ;;  %359 = vst.msk [vmem:[#allocation2 + $0x30] sm:$0xff] %vm352_vm3, %v1016_v58 }
  0x26   : > { %360 = vst.msk [vmem:[#allocation2 + $0x38] sm:$0xff] %vm352_vm3, %v1016_v58 }
  0x27   : > { %361 = vst.msk [vmem:[#allocation2 + $0x40] sm:$0xff] %vm352_vm3, %v1016_v58 }
  0x28   : > { %362 = vst.msk [vmem:[#allocation2 + $0x48] sm:$0xff] %vm352_vm3, %v1016_v58 }
  0x29   : > { %363 = vst.msk [vmem:[#allocation2 + $0x50] sm:$0xff] %vm352_vm3, %v1016_v58 }
  0x2a   : > { %364 = vst.msk [vmem:[#allocation2 + $0x58] sm:$0xff] %vm352_vm3, %v1016_v58 }
  0x2b   : > { %365 = vst.msk [vmem:[#allocation2 + $0x60] sm:$0xff] %vm352_vm3, %v1016_v58 }
  0x2c   : > { %366 = vst.msk [vmem:[#allocation2 + $0x68] sm:$0xff] %vm352_vm3, %v1016_v58 }
  0x2d   : > { %367 = vst.msk [vmem:[#allocation2 + $0x70] sm:$0xff] %vm352_vm3, %v1016_v58 }
  0x2e   : > { %368 = vst.msk [vmem:[#allocation2 + $0x78] sm:$0xff] %vm352_vm3, %v1016_v58 }
  0x32   : > { %922 = vmatmul.msk.bf16.gmra.mxu0 %vm430_vm2, %v951_v4  ;;  %927 = vmatmul.msk.bf16.gmra.mxu3 %vm430_vm2, %v956_v8 }
  0x42   : > { %923 = vmatmul.msk.bf16.gmra.mxu0 %vm430_vm2, %v952_v5  ;;  %928 = vmatmul.msk.bf16.gmra.mxu3 %vm430_vm2, %v957_v10  ;;  %v525_v10 = vld [vmem:[#allocation2 + $0x8] sm:$0xff] }
  0x52   : > { %924 = vmatmul.msk.bf16.gmra.mxu0 %vm430_vm2, %v953_v7  ;;  %v524_v7 = vld [vmem:[#allocation2] sm:$0xff] }
  0x62   : > { %925 = vmatmul.msk.bf16.gmra.mxu0 %vm430_vm2, %v954_v9 }
  0x9f   : > { %v468_v13 = vpop.f32.mrf.mxu0 }
  0xa0   : > { %v469_v15 = vadd.f32 %v1178_v14, %v468_v13 }
  0xa2   : > { %v508_v18 = vmax.f32 %v469_v15, 0.0 }
  0xa5   : > { %v493_v43 = vpop.f32.mrf.mxu3 }
  0xa6   : > { %v494_v52 = vadd.f32 %v1178_v14, %v493_v43 }
  0xa7   : > { %v470_v16 = vpop.f32.mrf.mxu0 }
  0xa8   : > { %v471_v17 = vadd.f32 %v1178_v14, %v470_v16  ;;  %v518_v54 = vmax.f32 %v494_v52, 0.0 }
  0xaa   : > { %v509_v19 = vmax.f32 %v471_v17, 0.0  ;;  %v725_v17 = vld [vmem:[%s1385_s5] sm:$0xff] }
  0xac   : > { %v540_v20 = vpack.c.bf16 %v509_v19, %v508_v18  ;;  %v526_v18 = vld [vmem:[#allocation2 + $0x10] sm:$0xff] }
  0xad   : > { %v495_v47 = vpop.f32.mrf.mxu3 }
  0xae   : > { %937 = vmatmul.msk.bf16.vlgmr.msra.gmra.mxu1 %vm352_vm3, %v540_v20  ;;  %v496_v53 = vadd.f32 %v1178_v14, %v495_v47 }
  0xaf   : > { %v473_v21 = vpop.f32.mrf.mxu0 }
  0xb0   : > { %v474_v22 = vadd.f32 %v1178_v14, %v473_v21  ;;  %v519_v55 = vmax.f32 %v496_v53, 0.0  ;;  %v729_v53 = vld [vmem:[%s1385_s5 + $0x20] sm:$0xff] }
  0xb2   : > { %v510_v25 = vmax.f32 %v474_v22, 0.0  ;;  %v545_v56 = vpack.c.bf16 %v519_v55, %v518_v54  ;;  %v530_v54 = vld [vmem:[#allocation2 + $0x30] sm:$0xff] }
  0xb5   : > { %v498_v51 = vpop.f32.mrf.mxu3 }
  0xb6   : > { %v499_v59 = vadd.f32 %v1178_v14, %v498_v51 }
  0xb7   : > { %v475_v23 = vpop.f32.mrf.mxu0 }
  0xb8   : > { %v476_v24 = vadd.f32 %v1178_v14, %v475_v23  ;;  %v520_v62 = vmax.f32 %v499_v59, 0.0 }
  0xba   : > { %v511_v26 = vmax.f32 %v476_v24, 0.0 }
  0xbc   : > { %v541_v27 = vpack.c.bf16 %v511_v26, %v510_v25  ;;  %v726_v26 = vld [vmem:[%s1385_s5 + $0x8] sm:$0xff] }
  0xbd   : > { %v500_v57 = vpop.f32.mrf.mxu3 }
  0xbe   : > { %938 = vmatmul.msk.bf16.gmra.mxu1 %vm352_vm3, %v541_v27  ;;  %v501_v60 = vadd.f32 %v1178_v14, %v500_v57  ;;  %v527_v27 = vld [vmem:[#allocation2 + $0x18] sm:$0xff] }
  0xbf   : > { %v478_v28 = vpop.f32.mrf.mxu0 }
  0xc0   : > { %v479_v29 = vadd.f32 %v1178_v14, %v478_v28  ;;  %v521_v63 = vmax.f32 %v501_v60, 0.0 }
  0xc2   : > { %v512_v32 = vmax.f32 %v479_v29, 0.0  ;;  %v546_v0 = vpack.c.bf16 %v521_v63, %v520_v62  ;;  %v730_v62 = vld [vmem:[%s1385_s5 + $0x28] sm:$0xff]  ;;  %v531_v63 = vld [vmem:[#allocation2 + $0x38] sm:$0xff] }
  0xc5   : > { %v503_v61 = vpop.f32.mrf.mxu3 }
  0xc6   : > { %v504_v2 = vadd.f32 %v1178_v14, %v503_v61 }
  0xc7   : > { %v480_v30 = vpop.f32.mrf.mxu0 }
  0xc8   : > { %v481_v31 = vadd.f32 %v1178_v14, %v480_v30  ;;  %v522_v4 = vmax.f32 %v504_v2, 0.0 }
  0xca   : > { %v513_v33 = vmax.f32 %v481_v31, 0.0 }
  0xcc   : > { %v542_v34 = vpack.c.bf16 %v513_v33, %v512_v32 }
  0xcd   : > { %v505_v1 = vpop.f32.mrf.mxu3 }
  0xce   : > { %939 = vmatmul.msk.bf16.gmra.mxu1 %vm352_vm3, %v542_v34  ;;  %v506_v3 = vadd.f32 %v1178_v14, %v505_v1 }
  0xcf   : > { %v483_v35 = vpop.f32.mrf.mxu0 }
  0xd0   : > { %v484_v36 = vadd.f32 %v1178_v14, %v483_v35  ;;  %v523_v5 = vmax.f32 %v506_v3, 0.0  ;;  %v528_v35 = vld [vmem:[#allocation2 + $0x20] sm:$0xff] }
  0xd2   : > { %v514_v39 = vmax.f32 %v484_v36, 0.0  ;;  %v547_v6 = vpack.c.bf16 %v523_v5, %v522_v4  ;;  %v727_v36 = vld [vmem:[%s1385_s5 + $0x10] sm:$0xff] }
  0xd7   : > { %v485_v37 = vpop.f32.mrf.mxu0 }
  0xd8   : > { %v486_v38 = vadd.f32 %v1178_v14, %v485_v37 }
  0xda   : > { %v515_v40 = vmax.f32 %v486_v38, 0.0 }
  0xdc   : > { %v543_v41 = vpack.c.bf16 %v515_v40, %v514_v39 }
  0xde   : > { %940 = vmatmul.msk.bf16.gmra.mxu1 %vm352_vm3, %v543_v41 }
  0xdf   : > { %v488_v42 = vpop.f32.mrf.mxu0 }
  0xe0   : > { %v489_v44 = vadd.f32 %v1178_v14, %v488_v42 }
  0xe2   : > { %v516_v48 = vmax.f32 %v489_v44, 0.0  ;;  %v529_v44 = vld [vmem:[#allocation2 + $0x28] sm:$0xff] }
  0xe7   : > { %v490_v45 = vpop.f32.mrf.mxu0 }
  0xe8   : > { %v491_v46 = vadd.f32 %v1178_v14, %v490_v45  ;;  %v728_v45 = vld [vmem:[%s1385_s5 + $0x18] sm:$0xff] }
  0xea   : > { %v517_v49 = vmax.f32 %v491_v46, 0.0 }
  0xec   : > { %v544_v50 = vpack.c.bf16 %v517_v49, %v516_v48 }
  0xee   : > { %941 = vmatmul.msk.bf16.vlgmr.msra.gmra.mxu2 %vm352_vm3, %v544_v50 }
  0xfe   : > { %942 = vmatmul.msk.bf16.gmra.mxu2 %vm352_vm3, %v545_v56 }
 0x10e   : > { %943 = vmatmul.msk.bf16.gmra.mxu2 %vm352_vm3, %v546_v0 }
 0x11e   : > { %944 = vmatmul.msk.bf16.gmra.mxu2 %vm352_vm3, %v547_v6 }
 0x12b   : > { %v598_v8 = vpop.f32.mrf.mxu1 }
 0x12c   : > { %v638_v9 = vadd.f32 %v598_v8, %v524_v7  ;;  %v731_v7 = vld [vmem:[%s1385_s5 + $0x30] sm:$0xff] }
 0x12e   : > { %654 = vst.msk [vmem:[#allocation2] sm:$0xff] %vm352_vm3, %v638_v9 }
 0x133   : > { %v600_v12 = vpop.f32.mrf.mxu1 }
 0x134   : > { %v639_v13 = vadd.f32 %v600_v12, %v525_v10 }
 0x135   : > { %v673_v14 = vld [vmem:[#allocation2] sm:$0xff] }
 0x136   : > { %v693_v15 = vadd.f32 %v1226_v11, %v673_v14  ;;  %655 = vst.msk [vmem:[#allocation2 + $0x8] sm:$0xff] %vm352_vm3, %v639_v13  ;;  %v532_v13 = vld [vmem:[#allocation2 + $0x40] sm:$0xff] }
 0x138   : > { %v709_v16 = vmax.f32 %v693_v15, 0.0 }
 0x13a   : > { %v741_v19 = vmul.f32 0.16666667, %v709_v16  ;;  %v732_v16 = vld [vmem:[%s1385_s5 + $0x38] sm:$0xff] }
 0x13b   : > { %v603_v20 = vpop.f32.mrf.mxu1 }
 0x13c   : > { %v757_v21 = vadd.f32 %v741_v19, %v725_v17  ;;  %v640_v22 = vadd.f32 %v603_v20, %v526_v18  ;;  %v533_v20 = vld [vmem:[#allocation2 + $0x48] sm:$0xff] }
 0x13d   : > { %v674_v23 = vld [vmem:[#allocation2 + $0x8] sm:$0xff] }
 0x13e   : > { %773 = vst.msk [vmem:[%s1385_s5] sm:$0xff] %vm352_vm3, %v757_v21  ;;  %v694_v24 = vadd.f32 %v1226_v11, %v674_v23 }
 0x13f   : > { %656 = vst.msk [vmem:[#allocation2 + $0x10] sm:$0xff] %vm352_vm3, %v640_v22 }
 0x140   : > { %v710_v25 = vmax.f32 %v694_v24, 0.0 }
 0x142   : > { %v742_v28 = vmul.f32 0.16666667, %v710_v25 }
 0x143   : > { %v605_v29 = vpop.f32.mrf.mxu1 }
 0x144   : > { %v758_v30 = vadd.f32 %v742_v28, %v726_v26  ;;  %v641_v31 = vadd.f32 %v605_v29, %v527_v27  ;;  %v733_v26 = vld [vmem:[%s1385_s5 + $0x40] sm:$0xff]  ;;  %v534_v27 = vld [vmem:[#allocation2 + $0x50] sm:$0xff] }
 0x146   : > { %774 = vst.msk [vmem:[%s1385_s5 + $0x8] sm:$0xff] %vm352_vm3, %v758_v30  ;;  %v675_v32 = vld [vmem:[#allocation2 + $0x10] sm:$0xff] }
 0x147   : > { %v695_v33 = vadd.f32 %v1226_v11, %v675_v32  ;;  %657 = vst.msk [vmem:[#allocation2 + $0x18] sm:$0xff] %vm352_vm3, %v641_v31 }
 0x149   : > { %v711_v34 = vmax.f32 %v695_v33, 0.0 }
 0x14b   : > { %v743_v37 = vmul.f32 0.16666667, %v711_v34  ;;  %v608_v38 = vpop.f32.mrf.mxu1 }
 0x14c   : > { %v642_v39 = vadd.f32 %v608_v38, %v528_v35  ;;  %v734_v35 = vld [vmem:[%s1385_s5 + $0x48] sm:$0xff] }
 0x14d   : > { %v759_v40 = vadd.f32 %v743_v37, %v727_v36  ;;  %v535_v36 = vld [vmem:[#allocation2 + $0x58] sm:$0xff] }
 0x14e   : > { %v676_v41 = vld [vmem:[#allocation2 + $0x18] sm:$0xff]  ;;  %658 = vst.msk [vmem:[#allocation2 + $0x20] sm:$0xff] %vm352_vm3, %v642_v39 }
 0x14f   : > { %775 = vst.msk [vmem:[%s1385_s5 + $0x10] sm:$0xff] %vm352_vm3, %v759_v40  ;;  %v696_v42 = vadd.f32 %v1226_v11, %v676_v41 }
 0x151   : > { %v712_v43 = vmax.f32 %v696_v42, 0.0 }
 0x153   : > { %v744_v46 = vmul.f32 0.16666667, %v712_v43  ;;  %v610_v47 = vpop.f32.mrf.mxu1 }
 0x154   : > { %v643_v48 = vadd.f32 %v610_v47, %v529_v44  ;;  %v536_v44 = vld [vmem:[#allocation2 + $0x60] sm:$0xff] }
 0x155   : > { %v760_v49 = vadd.f32 %v744_v46, %v728_v45  ;;  %v677_v50 = vld [vmem:[#allocation2 + $0x20] sm:$0xff]  ;;  %v735_v45 = vld [vmem:[%s1385_s5 + $0x50] sm:$0xff] }
 0x156   : > { %v697_v51 = vadd.f32 %v1226_v11, %v677_v50  ;;  %659 = vst.msk [vmem:[#allocation2 + $0x28] sm:$0xff] %vm352_vm3, %v643_v48 }
 0x157   : > { %776 = vst.msk [vmem:[%s1385_s5 + $0x18] sm:$0xff] %vm352_vm3, %v760_v49 }
 0x158   : > { %v713_v52 = vmax.f32 %v697_v51, 0.0 }
 0x15a   : > { %v745_v55 = vmul.f32 0.16666667, %v713_v52 }
 0x15b   : > { %v613_v56 = vpop.f32.mrf.mxu1 }
 0x15c   : > { %v761_v57 = vadd.f32 %v745_v55, %v729_v53  ;;  %v644_v58 = vadd.f32 %v613_v56, %v530_v54  ;;  %v537_v53 = vld [vmem:[#allocation2 + $0x68] sm:$0xff]  ;;  %v736_v54 = vld [vmem:[%s1385_s5 + $0x58] sm:$0xff] }
 0x15d   : > { %v678_v59 = vld [vmem:[#allocation2 + $0x28] sm:$0xff] }
 0x15e   : > { %777 = vst.msk [vmem:[%s1385_s5 + $0x20] sm:$0xff] %vm352_vm3, %v761_v57  ;;  %v698_v60 = vadd.f32 %v1226_v11, %v678_v59 }
 0x15f   : > { %660 = vst.msk [vmem:[#allocation2 + $0x30] sm:$0xff] %vm352_vm3, %v644_v58 }
 0x160   : > { %v714_v61 = vmax.f32 %v698_v60, 0.0 }
 0x162   : > { %v746_v0 = vmul.f32 0.16666667, %v714_v61 }
 0x163   : > { %v615_v1 = vpop.f32.mrf.mxu1 }
 0x164   : > { %v762_v2 = vadd.f32 %v746_v0, %v730_v62  ;;  %v645_v3 = vadd.f32 %v615_v1, %v531_v63  ;;  %v737_v62 = vld [vmem:[%s1385_s5 + $0x60] sm:$0xff]  ;;  %v538_v63 = vld [vmem:[#allocation2 + $0x70] sm:$0xff] }
 0x166   : > { %778 = vst.msk [vmem:[%s1385_s5 + $0x28] sm:$0xff] %vm352_vm3, %v762_v2  ;;  %v679_v4 = vld [vmem:[#allocation2 + $0x30] sm:$0xff] }
 0x167   : > { %v699_v5 = vadd.f32 %v1226_v11, %v679_v4  ;;  %661 = vst.msk [vmem:[#allocation2 + $0x38] sm:$0xff] %vm352_vm3, %v645_v3 }
 0x169   : > { %v715_v6 = vmax.f32 %v699_v5, 0.0 }
 0x16b   : > { %v747_v8 = vmul.f32 0.16666667, %v715_v6 }
 0x16d   : > { %v763_v9 = vadd.f32 %v747_v8, %v731_v7  ;;  %v738_v7 = vld [vmem:[%s1385_s5 + $0x68] sm:$0xff]  ;;  %v539_v8 = vld [vmem:[#allocation2 + $0x78] sm:$0xff] }
 0x16e   : > { %v680_v10 = vld [vmem:[#allocation2 + $0x38] sm:$0xff] }
 0x16f   : > { %779 = vst.msk [vmem:[%s1385_s5 + $0x30] sm:$0xff] %vm352_vm3, %v763_v9  ;;  %v700_v12 = vadd.f32 %v1226_v11, %v680_v10 }
 0x171   : > { %v716_v14 = vmax.f32 %v700_v12, 0.0  ;;  %v618_v15 = vpop.f32.mrf.mxu2 }
 0x172   : > { %v646_v17 = vadd.f32 %v618_v15, %v532_v13 }
 0x173   : > { %v748_v18 = vmul.f32 0.16666667, %v716_v14 }
 0x174   : > { %662 = vst.msk [vmem:[#allocation2 + $0x40] sm:$0xff] %vm352_vm3, %v646_v17  ;;  %v739_v17 = vld [vmem:[%s1385_s5 + $0x70] sm:$0xff] }
 0x175   : > { %v764_v19 = vadd.f32 %v748_v18, %v732_v16 }
 0x177   : > { %780 = vst.msk [vmem:[%s1385_s5 + $0x38] sm:$0xff] %vm352_vm3, %v764_v19 }
 0x179   : > { %v620_v21 = vpop.f32.mrf.mxu2 }
 0x17a   : > { %v647_v22 = vadd.f32 %v620_v21, %v533_v20 }
 0x17b   : > { %v681_v23 = vld [vmem:[#allocation2 + $0x40] sm:$0xff] }
 0x17c   : > { %v701_v24 = vadd.f32 %v1226_v11, %v681_v23  ;;  %663 = vst.msk [vmem:[#allocation2 + $0x48] sm:$0xff] %vm352_vm3, %v647_v22  ;;  %v740_v23 = vld [vmem:[%s1385_s5 + $0x78] sm:$0xff] }
 0x17e   : > { %v717_v25 = vmax.f32 %v701_v24, 0.0 }
 0x180   : > { %v749_v28 = vmul.f32 0.16666667, %v717_v25 }
 0x181   : > { %v623_v29 = vpop.f32.mrf.mxu2 }
 0x182   : > { %v765_v30 = vadd.f32 %v749_v28, %v733_v26  ;;  %v648_v31 = vadd.f32 %v623_v29, %v534_v27 }
 0x183   : > { %v682_v32 = vld [vmem:[#allocation2 + $0x48] sm:$0xff] }
 0x184   : > { %781 = vst.msk [vmem:[%s1385_s5 + $0x40] sm:$0xff] %vm352_vm3, %v765_v30  ;;  %v702_v33 = vadd.f32 %v1226_v11, %v682_v32 }
 0x185   : > { %664 = vst.msk [vmem:[#allocation2 + $0x50] sm:$0xff] %vm352_vm3, %v648_v31 }
 0x186   : > { %v718_v34 = vmax.f32 %v702_v33, 0.0 }
 0x188   : > { %v750_v37 = vmul.f32 0.16666667, %v718_v34 }
 0x189   : > { %v625_v38 = vpop.f32.mrf.mxu2 }
 0x18a   : > { %v766_v39 = vadd.f32 %v750_v37, %v734_v35  ;;  %v649_v40 = vadd.f32 %v625_v38, %v535_v36 }
 0x18c   : > { %782 = vst.msk [vmem:[%s1385_s5 + $0x48] sm:$0xff] %vm352_vm3, %v766_v39  ;;  %v683_v41 = vld [vmem:[#allocation2 + $0x50] sm:$0xff] }
 0x18d   : > { %v703_v42 = vadd.f32 %v1226_v11, %v683_v41  ;;  %665 = vst.msk [vmem:[#allocation2 + $0x58] sm:$0xff] %vm352_vm3, %v649_v40 }
 0x18f   : > { %v719_v43 = vmax.f32 %v703_v42, 0.0 }
 0x191   : > { %v751_v46 = vmul.f32 0.16666667, %v719_v43  ;;  %v628_v47 = vpop.f32.mrf.mxu2 }
 0x192   : > { %v650_v48 = vadd.f32 %v628_v47, %v536_v44 }
 0x193   : > { %v767_v49 = vadd.f32 %v751_v46, %v735_v45 }
 0x194   : > { %v684_v50 = vld [vmem:[#allocation2 + $0x58] sm:$0xff]  ;;  %666 = vst.msk [vmem:[#allocation2 + $0x60] sm:$0xff] %vm352_vm3, %v650_v48 }
 0x195   : > { %783 = vst.msk [vmem:[%s1385_s5 + $0x50] sm:$0xff] %vm352_vm3, %v767_v49  ;;  %v704_v51 = vadd.f32 %v1226_v11, %v684_v50 }
 0x197   : > { %v720_v52 = vmax.f32 %v704_v51, 0.0 }
 0x199   : > { %v752_v55 = vmul.f32 0.16666667, %v720_v52  ;;  %v630_v56 = vpop.f32.mrf.mxu2 }
 0x19a   : > { %v651_v57 = vadd.f32 %v630_v56, %v537_v53 }
 0x19b   : > { %v768_v58 = vadd.f32 %v752_v55, %v736_v54  ;;  %v685_v59 = vld [vmem:[#allocation2 + $0x60] sm:$0xff] }
 0x19c   : > { %v705_v60 = vadd.f32 %v1226_v11, %v685_v59  ;;  %667 = vst.msk [vmem:[#allocation2 + $0x68] sm:$0xff] %vm352_vm3, %v651_v57 }
 0x19d   : > { %784 = vst.msk [vmem:[%s1385_s5 + $0x58] sm:$0xff] %vm352_vm3, %v768_v58 }
 0x19e   : > { %v721_v61 = vmax.f32 %v705_v60, 0.0 }
 0x1a0   : > { %v753_v0 = vmul.f32 0.16666667, %v721_v61 }
 0x1a1   : > { %v633_v1 = vpop.f32.mrf.mxu2 }
 0x1a2   : > { %v769_v2 = vadd.f32 %v753_v0, %v737_v62  ;;  %v652_v3 = vadd.f32 %v633_v1, %v538_v63 }
 0x1a3   : > { %v686_v4 = vld [vmem:[#allocation2 + $0x68] sm:$0xff] }
 0x1a4   : > { %785 = vst.msk [vmem:[%s1385_s5 + $0x60] sm:$0xff] %vm352_vm3, %v769_v2  ;;  %v706_v5 = vadd.f32 %v1226_v11, %v686_v4 }
 0x1a5   : > { %668 = vst.msk [vmem:[#allocation2 + $0x70] sm:$0xff] %vm352_vm3, %v652_v3 }
 0x1a6   : > { %v722_v6 = vmax.f32 %v706_v5, 0.0 }
 0x1a8   : > { %v754_v9 = vmul.f32 0.16666667, %v722_v6 }
 0x1a9   : > { %v635_v10 = vpop.f32.mrf.mxu2 }
 0x1aa   : > { %v770_v12 = vadd.f32 %v754_v9, %v738_v7  ;;  %v653_v13 = vadd.f32 %v635_v10, %v539_v8 }
 0x1ac   : > { %786 = vst.msk [vmem:[%s1385_s5 + $0x68] sm:$0xff] %vm352_vm3, %v770_v12  ;;  %v687_v14 = vld [vmem:[#allocation2 + $0x70] sm:$0xff] }
 0x1ad   : > { %v707_v15 = vadd.f32 %v1226_v11, %v687_v14  ;;  %669 = vst.msk [vmem:[#allocation2 + $0x78] sm:$0xff] %vm352_vm3, %v653_v13 }
 0x1af   : > { %v723_v16 = vmax.f32 %v707_v15, 0.0 }
 0x1b1   : > { %v755_v18 = vmul.f32 0.16666667, %v723_v16 }
 0x1b3   : > { %v771_v19 = vadd.f32 %v755_v18, %v739_v17 }
 0x1b4   : > { %v688_v20 = vld [vmem:[#allocation2 + $0x78] sm:$0xff] }
 0x1b5   : > { %787 = vst.msk [vmem:[%s1385_s5 + $0x70] sm:$0xff] %vm352_vm3, %v771_v19  ;;  %v708_v21 = vadd.f32 %v1226_v11, %v688_v20 }
 0x1b7   : > { %v724_v22 = vmax.f32 %v708_v21, 0.0 }
 0x1b9   : > { %v756_v24 = vmul.f32 0.16666667, %v724_v22 }
 0x1bb   : > { %v772_v25 = vadd.f32 %v756_v24, %v740_v23 }
 0x1bd   : > { %788 = vst.msk [vmem:[%s1385_s5 + $0x78] sm:$0xff] %vm352_vm3, %v772_v25 }
 0x1be PF: > { %s15_s20 = sadd.s32 1, %s1013_s20   ;;  %s1386_s18 = smov %s1009_s19 }
 0x1bf   : > { %p12_p6 = scmp.ge.s32.totalorder %s15_s20, 8   ;;  %s1387_s19 = smov %s1389_s21 }
 0x1c1   :  { %14 = sbr.rel (!%p12_p6) target bundleno = 2 (0x2), region = 90 }

// kernel: forward.6
= control target key start
LH: loop header
LB: loop body
LE: loop exit
PB: predicated region body
PF: predicated region fallthrough
CT: control target
= control target key end

     0   :  { %s1162_s12 = smov 0   ;;  %s1289_s0 = inlined_call_operand.vmem [shape: f32[128,4,8], index: 0, kind: input, shape index: {}]   ;;  %s1290_s1 = inlined_call_operand.vmem [shape: f32[8,4], index: 1, kind: input, shape index: {}]   ;;  %s1291_s2 = inlined_call_operand.vmem [shape: f32[8,16], index: 2, kind: input, shape index: {}]   ;;  %s1292_s3 = inlined_call_operand.vmem [shape: f32[128,8,16], index: 3, kind: output, shape index: {}]  }
   0x1 LB: > { %s1037_s13 = sadd.s32 4294967295, %s1140_s12   ;;  %p1041_p0 = scmp.ge.s32.totalorder %s1140_s12, 1  ;;  %s1140_s12 = sphi %s1162_s12, %s13_s12  }
   0x2   : > { %p138_p1 = scmp.lt.s32.totalorder %s1140_s12, 9 }
   0x4   : > { %p139_p2 = pnand %p1041_p0, %p138_p1 }
   0x5   : > { %s1042_s14 = sshll.u32 (!%p139_p2), %s1037_s13, 4 }
   0x6   : > { %142 = sbr.rel (%p139_p2) target bundleno = 337 (0x151), region = 32  ;;  %p163_p3 = scmp.lt.s32.totalorder (!%p139_p2), %s1042_s14, 127 }
   0xb   : > { %s1294_s14 = smov (!%p163_p3, %s1042_s14), 127  ;;  %vm181_vm0 = vcmask 1043456   ;;  %v174_v0 = vld [vmem:[%s1290_s1] sm:$0xff]  ;;  %vm177_vm1 = vcmask 31744   ;;  %vm205_vm2 = vcmask 64512   ;;  %vm229_vm3 = vcmask 130048  }
   0xc   : > { %s1043_s15 = sshll.u32 %s1294_s14, 2  ;;  %v175_v17 = vld [vmem:[%s1291_s2] sm:$0xff]  ;;  %s1045_s23 = sshll.u32 %s1294_s14, 3 }
   0xd   : > { %s1176_s18 = scalar_lea.vmem %s1289_s0, %s1043_s15  ;;  %274 = vmatpush.msra.mxu3 %v175_v17  ;;  %224 = vmatpush.msra.mxu1 %v175_v17  ;;  %s1252_s26 = scalar_lea.vmem %s1292_s3, %s1045_s23 }
   0xe   : > { %v1049_v1 = vld [vmem:[%s1176_s18 + $0x4] sm:$0xf]  ;;  %v1059_v2 = vld [vmem:[%s1176_s18 + $0xc] sm:$0xf]  ;;  %v1069_v3 = vld [vmem:[%s1176_s18 + $0x14] sm:$0xf] }
   0xf   : > { %1050 = vmatpush.msk.msra.mxu2 %vm181_vm0, %v1049_v1  ;;  %v176_v4 = vld [vmem:[%s1176_s18] sm:$0xf]  ;;  %v1054_v5 = vld [vmem:[%s1176_s18 + $0x8] sm:$0xf]  ;;  %v1064_v6 = vld [vmem:[%s1176_s18 + $0x10] sm:$0xf]  ;;  %374 = vmatpush.msrb.mxu3 %v175_v17 }
  0x10   : > { %1051 = vmatmul.msk.f32.vlgmr.msra.gmra.mxu2 %vm177_vm1, %v174_v0  ;;  %1046 = vmatpush.msk.msra.mxu0 %vm181_vm0, %v176_v4  ;;  %v1079_v7 = vld [vmem:[%s1176_s18 + $0x1c] sm:$0xf]  ;;  %v1074_v8 = vld [vmem:[%s1176_s18 + $0x18] sm:$0xf]  ;;  %v1089_v9 = vld [vmem:[%s1176_s18 + $0x24] sm:$0xf] }
  0x11   : > { %1060 = vmatpush.msk.msrb.mxu2 %vm181_vm0, %v1059_v2  ;;  %1047 = vmatmul.msk.f32.vlgmr.msra.gmra.mxu0 %vm177_vm1, %v174_v0  ;;  %v1084_v10 = vld [vmem:[%s1176_s18 + $0x20] sm:$0xf]  ;;  %v1099_v11 = vld [vmem:[%s1176_s18 + $0x2c] sm:$0xf]  ;;  %v1094_v12 = vld [vmem:[%s1176_s18 + $0x28] sm:$0xf] }
  0x12   : > { %1055 = vmatpush.msk.msrb.mxu0 %vm181_vm0, %v1054_v5  ;;  %v1109_v13 = vld [vmem:[%s1176_s18 + $0x34] sm:$0xf]  ;;  %v1104_v14 = vld [vmem:[%s1176_s18 + $0x30] sm:$0xf]  ;;  %v1119_v15 = vld [vmem:[%s1176_s18 + $0x3c] sm:$0xf]  ;;  %324 = vmatpush.msrb.mxu1 %v175_v17 }
  0x13   : > { %1070 = vmatpush.msk.msra.mxu2 %vm181_vm0, %v1069_v3  ;;  %v1114_v16 = vld [vmem:[%s1176_s18 + $0x38] sm:$0xf] }
  0x14   : > { %1065 = vmatpush.msk.msra.mxu0 %vm181_vm0, %v1064_v6 }
  0x18   : > { %1061 = vmatmul.msk.f32.vlgmr.msrb.gmra.mxu2 %vm177_vm1, %v174_v0 }
  0x19   : > { %1080 = vmatpush.msk.msrb.mxu2 %vm181_vm0, %v1079_v7  ;;  %1056 = vmatmul.msk.f32.vlgmr.msrb.gmra.mxu0 %vm177_vm1, %v174_v0 }
  0x1a   : > { %1075 = vmatpush.msk.msrb.mxu0 %vm181_vm0, %v1074_v8 }
  0x20   : > { %1071 = vmatmul.msk.f32.vlgmr.msra.gmra.mxu2 %vm177_vm1, %v174_v0 }
  0x21   : > { %1090 = vmatpush.msk.msra.mxu2 %vm181_vm0, %v1089_v9  ;;  %1066 = vmatmul.msk.f32.vlgmr.msra.gmra.mxu0 %vm177_vm1, %v174_v0 }
  0x22   : > { %1085 = vmatpush.msk.msra.mxu0 %vm181_vm0, %v1084_v10 }
  0x28   : > { %1081 = vmatmul.msk.f32.vlgmr.msrb.gmra.mxu2 %vm177_vm1, %v174_v0 }
  0x29   : > { %1100 = vmatpush.msk.msrb.mxu2 %vm181_vm0, %v1099_v11  ;;  %1076 = vmatmul.msk.f32.vlgmr.msrb.gmra.mxu0 %vm177_vm1, %v174_v0 }
  0x2a   : > { %1095 = vmatpush.msk.msrb.mxu0 %vm181_vm0, %v1094_v12 }
  0x30   : > { %1091 = vmatmul.msk.f32.vlgmr.msra.gmra.mxu2 %vm177_vm1, %v174_v0 }
  0x31   : > { %1110 = vmatpush.msk.msra.mxu2 %vm181_vm0, %v1109_v13  ;;  %1086 = vmatmul.msk.f32.vlgmr.msra.gmra.mxu0 %vm177_vm1, %v174_v0 }
  0x32   : > { %1105 = vmatpush.msk.msra.mxu0 %vm181_vm0, %v1104_v14 }
  0x38   : > { %1101 = vmatmul.msk.f32.vlgmr.msrb.gmra.mxu2 %vm177_vm1, %v174_v0 }
  0x39   : > { %1120 = vmatpush.msk.msrb.mxu2 %vm181_vm0, %v1119_v15  ;;  %1096 = vmatmul.msk.f32.vlgmr.msrb.gmra.mxu0 %vm177_vm1, %v174_v0 }
  0x3a   : > { %1115 = vmatpush.msk.msrb.mxu0 %vm181_vm0, %v1114_v16 }
  0x40   : > { %1111 = vmatmul.msk.f32.vlgmr.msra.gmra.mxu2 %vm177_vm1, %v174_v0 }
  0x41   : > { %1106 = vmatmul.msk.f32.vlgmr.msra.gmra.mxu0 %vm177_vm1, %v174_v0 }
  0x48   : > { %1121 = vmatmul.msk.f32.vlgmr.msrb.gmra.mxu2 %vm177_vm1, %v174_v0 }
  0x49   : > { %1116 = vmatmul.msk.f32.vlgmr.msrb.gmra.mxu0 %vm177_vm1, %v174_v0 }
  0x8e   : > { %v202_v18 = vpop.f32.mrf.mxu0 }
  0x8f   : > { %1048 = vmatmul.msk.f32.vlgmr.msra.gmra.mxu1 %vm205_vm2, %v202_v18 }
  0x90   : > { %424 = vmatpush.msra.mxu1 %v175_v17 }
  0x93   : > { %v253_v19 = vpop.f32.mrf.mxu2 }
  0x94   : > { %1052 = vmatmul.msk.f32.vlgmr.msra.gmra.mxu3 %vm205_vm2, %v253_v19 }
  0x95   : > { %474 = vmatpush.msra.mxu3 %v175_v17 }
  0x96   : > { %v303_v20 = vpop.f32.mrf.mxu0 }
  0x97   : > { %1057 = vmatmul.msk.f32.vlgmr.msrb.gmra.mxu1 %vm205_vm2, %v303_v20 }
  0x98   : > { %524 = vmatpush.msrb.mxu1 %v175_v17 }
  0x9b   : > { %v353_v21 = vpop.f32.mrf.mxu2 }
  0x9c   : > { %1062 = vmatmul.msk.f32.vlgmr.msrb.gmra.mxu3 %vm205_vm2, %v353_v21 }
  0x9d   : > { %574 = vmatpush.msrb.mxu3 %v175_v17 }
  0x9e   : > { %v403_v22 = vpop.f32.mrf.mxu0 }
  0x9f   : > { %1067 = vmatmul.msk.f32.vlgmr.msra.gmra.mxu1 %vm205_vm2, %v403_v22 }
  0xa0   : > { %624 = vmatpush.msra.mxu1 %v175_v17 }
  0xa3   : > { %v453_v23 = vpop.f32.mrf.mxu2 }
  0xa4   : > { %1072 = vmatmul.msk.f32.vlgmr.msra.gmra.mxu3 %vm205_vm2, %v453_v23 }
  0xa5   : > { %674 = vmatpush.msra.mxu3 %v175_v17 }
  0xa6   : > { %v503_v24 = vpop.f32.mrf.mxu0 }
  0xa7   : > { %1077 = vmatmul.msk.f32.vlgmr.msrb.gmra.mxu1 %vm205_vm2, %v503_v24 }
  0xa8   : > { %724 = vmatpush.msrb.mxu1 %v175_v17 }
  0xab   : > { %v553_v25 = vpop.f32.mrf.mxu2 }
  0xac   : > { %1082 = vmatmul.msk.f32.vlgmr.msrb.gmra.mxu3 %vm205_vm2, %v553_v25 }
  0xad   : > { %774 = vmatpush.msrb.mxu3 %v175_v17 }
  0xae   : > { %v603_v26 = vpop.f32.mrf.mxu0 }
  0xaf   : > { %1087 = vmatmul.msk.f32.vlgmr.msra.gmra.mxu1 %vm205_vm2, %v603_v26 }
  0xb0   : > { %824 = vmatpush.msra.mxu1 %v175_v17 }
  0xb3   : > { %v653_v27 = vpop.f32.mrf.mxu2 }
  0xb4   : > { %1092 = vmatmul.msk.f32.vlgmr.msra.gmra.mxu3 %vm205_vm2, %v653_v27 }
  0xb5   : > { %874 = vmatpush.msra.mxu3 %v175_v17 }
  0xb6   : > { %v703_v28 = vpop.f32.mrf.mxu0 }
  0xb7   : > { %1097 = vmatmul.msk.f32.vlgmr.msrb.gmra.mxu1 %vm205_vm2, %v703_v28 }
  0xb8   : > { %924 = vmatpush.msrb.mxu1 %v175_v17 }
  0xbb   : > { %v753_v29 = vpop.f32.mrf.mxu2 }
  0xbc   : > { %1102 = vmatmul.msk.f32.vlgmr.msrb.gmra.mxu3 %vm205_vm2, %v753_v29 }
  0xbd   : > { %974 = vmatpush.msrb.mxu3 %v175_v17 }
  0xbe   : > { %v803_v30 = vpop.f32.mrf.mxu0 }
  0xbf   : > { %1107 = vmatmul.msk.f32.vlgmr.msra.gmra.mxu1 %vm205_vm2, %v803_v30 }
  0xc3   : > { %v853_v31 = vpop.f32.mrf.mxu2 }
  0xc4   : > { %1112 = vmatmul.msk.f32.vlgmr.msra.gmra.mxu3 %vm205_vm2, %v853_v31 }
  0xc6   : > { %v903_v32 = vpop.f32.mrf.mxu0 }
  0xc7   : > { %1117 = vmatmul.msk.f32.vlgmr.msrb.gmra.mxu1 %vm205_vm2, %v903_v32 }
  0xcb   : > { %v953_v33 = vpop.f32.mrf.mxu2 }
  0xcc   : > { %1122 = vmatmul.msk.f32.vlgmr.msrb.gmra.mxu3 %vm205_vm2, %v953_v33 }
 0x10c   : > { %v226_v34 = vpop.f32.mrf.mxu1 }
 0x10d   : > { %230 = vst.msk [vmem:[%s1252_s26] sm:$0xff] %vm229_vm3, %v226_v34 }
 0x114   : > { %v326_v35 = vpop.f32.mrf.mxu1 }
 0x115   : > { %1058 = vst.msk [vmem:[%s1252_s26 + $0x10] sm:$0xff] %vm229_vm3, %v326_v35 }
 0x117   : > { %v276_v36 = vpop.f32.mrf.mxu3 }
 0x118   : > { %1053 = vst.msk [vmem:[%s1252_s26 + $0x8] sm:$0xff] %vm229_vm3, %v276_v36 }
 0x11c   : > { %v426_v37 = vpop.f32.mrf.mxu1 }
 0x11d   : > { %1068 = vst.msk [vmem:[%s1252_s26 + $0x20] sm:$0xff] %vm229_vm3, %v426_v37 }
 0x11f   : > { %v376_v38 = vpop.f32.mrf.mxu3 }
 0x120   : > { %1063 = vst.msk [vmem:[%s1252_s26 + $0x18] sm:$0xff] %vm229_vm3, %v376_v38 }
 0x124   : > { %v526_v39 = vpop.f32.mrf.mxu1 }
 0x125   : > { %1078 = vst.msk [vmem:[%s1252_s26 + $0x30] sm:$0xff] %vm229_vm3, %v526_v39 }
 0x127   : > { %v476_v40 = vpop.f32.mrf.mxu3 }
 0x128   : > { %1073 = vst.msk [vmem:[%s1252_s26 + $0x28] sm:$0xff] %vm229_vm3, %v476_v40 }
 0x12c   : > { %v626_v41 = vpop.f32.mrf.mxu1 }
 0x12d   : > { %1088 = vst.msk [vmem:[%s1252_s26 + $0x40] sm:$0xff] %vm229_vm3, %v626_v41 }
 0x12f   : > { %v576_v42 = vpop.f32.mrf.mxu3 }
 0x130   : > { %1083 = vst.msk [vmem:[%s1252_s26 + $0x38] sm:$0xff] %vm229_vm3, %v576_v42 }
 0x134   : > { %v726_v43 = vpop.f32.mrf.mxu1 }
 0x135   : > { %1098 = vst.msk [vmem:[%s1252_s26 + $0x50] sm:$0xff] %vm229_vm3, %v726_v43 }
 0x137   : > { %v676_v44 = vpop.f32.mrf.mxu3 }
 0x138   : > { %1093 = vst.msk [vmem:[%s1252_s26 + $0x48] sm:$0xff] %vm229_vm3, %v676_v44 }
 0x13c   : > { %v826_v45 = vpop.f32.mrf.mxu1 }
 0x13d   : > { %1108 = vst.msk [vmem:[%s1252_s26 + $0x60] sm:$0xff] %vm229_vm3, %v826_v45 }
 0x13f   : > { %v776_v46 = vpop.f32.mrf.mxu3 }
 0x140   : > { %1103 = vst.msk [vmem:[%s1252_s26 + $0x58] sm:$0xff] %vm229_vm3, %v776_v46 }
 0x144   : > { %v926_v47 = vpop.f32.mrf.mxu1 }
 0x145   : > { %1118 = vst.msk [vmem:[%s1252_s26 + $0x70] sm:$0xff] %vm229_vm3, %v926_v47 }
 0x147   : > { %v876_v48 = vpop.f32.mrf.mxu3 }
 0x148   : > { %1113 = vst.msk [vmem:[%s1252_s26 + $0x68] sm:$0xff] %vm229_vm3, %v876_v48 }
 0x14f   : > { %v976_v49 = vpop.f32.mrf.mxu3 }
 0x150   : > { %1123 = vst.msk [vmem:[%s1252_s26 + $0x78] sm:$0xff] %vm229_vm3, %v976_v49 }
 0x151 PF: > { %s13_s12 = sadd.s32 1, %s1140_s12  }
 0x152   : > { %p10_p4 = scmp.ge.s32.totalorder %s13_s12, 10  }
 0x154   :  { %12 = sbr.rel (!%p10_p4) target bundleno = 1 (0x1), region = 92 }

// kernel: forward.7
= control target key start
LH: loop header
LB: loop body
LE: loop exit
PB: predicated region body
PF: predicated region fallthrough
CT: control target
= control target key end

     0   :  { %vm216_vm0 = vcmask 1040384   ;;  %v481_v2 = vmov 0   ;;  %vm167_vm1 = vcmask 531456   ;;  %vm311_vm2 = vcmask 523264   ;;  %s746_s1 = inlined_call_operand.vmem [shape: bf16[65,64], index: 1, kind: input, shape index: {}]   ;;  %s747_s2 = inlined_call_operand.vmem [shape: f32[1,64], index: 2, kind: input, shape index: {}]   ;;  %s748_s0 = inlined_call_operand.vmem [shape: bf16[256,65], index: 0, kind: input, shape index: {}]   ;;  %s749_s3 = inlined_call_operand.vmem [shape: f32[256,64], index: 3, kind: output, shape index: {}]  }
   0x1   :  { %v55_v0 = vld [vmem:[%s746_s1 + $0x20] sm:$0x1]  ;;  %v218_v3 = vsel %vm216_vm0, 65535, %v481_v2  ;;  %v463_v6 = vld [vmem:[%s746_s1 + $0x18] sm:$0xff]  ;;  %v462_v7 = vld [vmem:[%s746_s1 + $0x10] sm:$0xff] }
   0x2   :  { %v157_v1 = vunpack.c.l.b16 %v55_v0  ;;  %v461_v8 = vld [vmem:[%s746_s1 + $0x8] sm:$0xff]  ;;  %v460_v9 = vld [vmem:[%s746_s1] sm:$0xff]  ;;  %v446_v18 = vld [vmem:[%s748_s0 + $0x10] sm:$0xff] }
   0x3   :  { %v444_v10 = vld [vmem:[%s748_s0] sm:$0xff]  ;;  %v445_v14 = vld [vmem:[%s748_s0 + $0x8] sm:$0xff]  ;;  %v450_v19 = vld [vmem:[%s748_s0 + $0x30] sm:$0xff] }
   0x4   :  { %v162_v4 = vpack.c.b16 %v157_v1, %v157_v1  ;;  %v448_v11 = vld [vmem:[%s748_s0 + $0x20] sm:$0xff]  ;;  %v449_v15 = vld [vmem:[%s748_s0 + $0x28] sm:$0xff]  ;;  %v454_v20 = vld [vmem:[%s748_s0 + $0x50] sm:$0xff] }
   0x5   :  { %v452_v12 = vld [vmem:[%s748_s0 + $0x40] sm:$0xff]  ;;  %v453_v16 = vld [vmem:[%s748_s0 + $0x48] sm:$0xff]  ;;  %v458_v21 = vld [vmem:[%s748_s0 + $0x70] sm:$0xff] }
   0x6   :  { %v220_v5 = vand.u32 %v218_v3, %v162_v4  ;;  %v456_v13 = vld [vmem:[%s748_s0 + $0x60] sm:$0xff]  ;;  %v457_v17 = vld [vmem:[%s748_s0 + $0x68] sm:$0xff]  ;;  %v447_v22 = vld [vmem:[%s748_s0 + $0x18] sm:$0xff] }
   0x7   :  { %v451_v23 = vld [vmem:[%s748_s0 + $0x38] sm:$0xff]  ;;  %v584_v26 = vld [vmem:[%s747_s2] ss:$0 sm:$0xff] }
   0x8   :  { %225 = vmatpush.bf16.msra.mxu0 %v220_v5  ;;  %464 = vmatpush.bf16.msra.mxu1 %v220_v5  ;;  %v455_v24 = vld [vmem:[%s748_s0 + $0x58] sm:$0xff] }
   0x9   :  { %465 = vmatpush.bf16.msra.mxu2 %v220_v5  ;;  %466 = vmatpush.bf16.msra.mxu3 %v220_v5  ;;  %v459_v25 = vld [vmem:[%s748_s0 + $0x78] sm:$0xff] }
   0xc   :  { %226 = vmatpush.bf16.msra.mxu0 %v463_v6  ;;  %467 = vmatpush.bf16.msra.mxu1 %v463_v6 }
   0xd   :  { %468 = vmatpush.bf16.msra.mxu2 %v463_v6  ;;  %469 = vmatpush.bf16.msra.mxu3 %v463_v6 }
  0x10   :  { %227 = vmatpush.bf16.msra.mxu0 %v462_v7  ;;  %470 = vmatpush.bf16.msra.mxu1 %v462_v7 }
  0x11   :  { %471 = vmatpush.bf16.msra.mxu2 %v462_v7  ;;  %472 = vmatpush.bf16.msra.mxu3 %v462_v7 }
  0x14   :  { %228 = vmatpush.bf16.msra.mxu0 %v461_v8  ;;  %473 = vmatpush.bf16.msra.mxu1 %v461_v8 }
  0x15   :  { %474 = vmatpush.bf16.msra.mxu2 %v461_v8  ;;  %475 = vmatpush.bf16.msra.mxu3 %v461_v8 }
  0x18   :  { %229 = vmatpush.bf16.msra.mxu0 %v460_v9  ;;  %476 = vmatpush.bf16.msra.mxu1 %v460_v9 }
  0x19   :  { %477 = vmatpush.bf16.msra.mxu2 %v460_v9  ;;  %478 = vmatpush.bf16.msra.mxu3 %v460_v9 }
  0x1b   :  { %428 = vmatmul.msk.bf16.vlgmr.msra.gmra.mxu0 %vm167_vm1, %v444_v10  ;;  %432 = vmatmul.msk.bf16.vlgmr.msra.gmra.mxu1 %vm167_vm1, %v448_v11 }
  0x1c   :  { %436 = vmatmul.msk.bf16.vlgmr.msra.gmra.mxu2 %vm167_vm1, %v452_v12  ;;  %440 = vmatmul.msk.bf16.vlgmr.msra.gmra.mxu3 %vm167_vm1, %v456_v13 }
  0x2b   :  { %429 = vmatmul.msk.bf16.gmra.mxu0 %vm167_vm1, %v445_v14  ;;  %433 = vmatmul.msk.bf16.gmra.mxu1 %vm167_vm1, %v449_v15 }
  0x2c   :  { %437 = vmatmul.msk.bf16.gmra.mxu2 %vm167_vm1, %v453_v16  ;;  %441 = vmatmul.msk.bf16.gmra.mxu3 %vm167_vm1, %v457_v17 }
  0x3b   :  { %430 = vmatmul.msk.bf16.gmra.mxu0 %vm167_vm1, %v446_v18  ;;  %434 = vmatmul.msk.bf16.gmra.mxu1 %vm167_vm1, %v450_v19 }
  0x3c   :  { %438 = vmatmul.msk.bf16.gmra.mxu2 %vm167_vm1, %v454_v20  ;;  %442 = vmatmul.msk.bf16.gmra.mxu3 %vm167_vm1, %v458_v21 }
  0x4b   :  { %431 = vmatmul.msk.bf16.gmra.mxu0 %vm167_vm1, %v447_v22  ;;  %435 = vmatmul.msk.bf16.gmra.mxu1 %vm167_vm1, %v451_v23 }
  0x4c   :  { %439 = vmatmul.msk.bf16.gmra.mxu2 %vm167_vm1, %v455_v24  ;;  %443 = vmatmul.msk.bf16.gmra.mxu3 %vm167_vm1, %v459_v25 }
  0x98   :  { %v231_v27 = vpop.f32.mrf.mxu0  ;;  %v251_v28 = vpop.f32.mrf.mxu1 }
  0x99   :  { %v232_v29 = vadd.f32 %v584_v26, %v231_v27  ;;  %v252_v30 = vadd.f32 %v584_v26, %v251_v28 }
  0x9b   :  { %312 = vst.msk [vmem:[%s749_s3] sm:$0xff] %vm311_vm2, %v232_v29 }
  0x9c   :  { %320 = vst.msk [vmem:[%s749_s3 + $0x40] sm:$0xff] %vm311_vm2, %v252_v30 }
  0x9f   :  { %v271_v31 = vpop.f32.mrf.mxu2  ;;  %v291_v32 = vpop.f32.mrf.mxu3 }
  0xa0   :  { %v272_v33 = vadd.f32 %v584_v26, %v271_v31  ;;  %v292_v34 = vadd.f32 %v584_v26, %v291_v32  ;;  %v233_v35 = vpop.f32.mrf.mxu0  ;;  %v253_v36 = vpop.f32.mrf.mxu1 }
  0xa1   :  { %v234_v37 = vadd.f32 %v584_v26, %v233_v35  ;;  %v254_v38 = vadd.f32 %v584_v26, %v253_v36 }
  0xa2   :  { %328 = vst.msk [vmem:[%s749_s3 + $0x80] sm:$0xff] %vm311_vm2, %v272_v33 }
  0xa3   :  { %336 = vst.msk [vmem:[%s749_s3 + $0xc0] sm:$0xff] %vm311_vm2, %v292_v34 }
  0xa4   :  { %313 = vst.msk [vmem:[%s749_s3 + $0x8] sm:$0xff] %vm311_vm2, %v234_v37 }
  0xa5   :  { %321 = vst.msk [vmem:[%s749_s3 + $0x48] sm:$0xff] %vm311_vm2, %v254_v38 }
  0xa7   :  { %v273_v39 = vpop.f32.mrf.mxu2  ;;  %v293_v40 = vpop.f32.mrf.mxu3 }
  0xa8   :  { %v274_v41 = vadd.f32 %v584_v26, %v273_v39  ;;  %v294_v42 = vadd.f32 %v584_v26, %v293_v40  ;;  %v236_v43 = vpop.f32.mrf.mxu0  ;;  %v256_v44 = vpop.f32.mrf.mxu1 }
  0xa9   :  { %v237_v45 = vadd.f32 %v584_v26, %v236_v43  ;;  %v257_v46 = vadd.f32 %v584_v26, %v256_v44 }
  0xaa   :  { %329 = vst.msk [vmem:[%s749_s3 + $0x88] sm:$0xff] %vm311_vm2, %v274_v41 }
  0xab   :  { %337 = vst.msk [vmem:[%s749_s3 + $0xc8] sm:$0xff] %vm311_vm2, %v294_v42 }
  0xac   :  { %314 = vst.msk [vmem:[%s749_s3 + $0x10] sm:$0xff] %vm311_vm2, %v237_v45 }
  0xad   :  { %322 = vst.msk [vmem:[%s749_s3 + $0x50] sm:$0xff] %vm311_vm2, %v257_v46 }
  0xaf   :  { %v276_v47 = vpop.f32.mrf.mxu2  ;;  %v296_v48 = vpop.f32.mrf.mxu3 }
  0xb0   :  { %v277_v49 = vadd.f32 %v584_v26, %v276_v47  ;;  %v297_v50 = vadd.f32 %v584_v26, %v296_v48  ;;  %v238_v51 = vpop.f32.mrf.mxu0  ;;  %v258_v52 = vpop.f32.mrf.mxu1 }
  0xb1   :  { %v239_v53 = vadd.f32 %v584_v26, %v238_v51  ;;  %v259_v54 = vadd.f32 %v584_v26, %v258_v52 }
  0xb2   :  { %330 = vst.msk [vmem:[%s749_s3 + $0x90] sm:$0xff] %vm311_vm2, %v277_v49 }
  0xb3   :  { %338 = vst.msk [vmem:[%s749_s3 + $0xd0] sm:$0xff] %vm311_vm2, %v297_v50 }
  0xb4   :  { %315 = vst.msk [vmem:[%s749_s3 + $0x18] sm:$0xff] %vm311_vm2, %v239_v53 }
  0xb5   :  { %323 = vst.msk [vmem:[%s749_s3 + $0x58] sm:$0xff] %vm311_vm2, %v259_v54 }
  0xb7   :  { %v278_v55 = vpop.f32.mrf.mxu2  ;;  %v298_v56 = vpop.f32.mrf.mxu3 }
  0xb8   :  { %v279_v57 = vadd.f32 %v584_v26, %v278_v55  ;;  %v299_v58 = vadd.f32 %v584_v26, %v298_v56  ;;  %v241_v59 = vpop.f32.mrf.mxu0  ;;  %v261_v60 = vpop.f32.mrf.mxu1 }
  0xb9   :  { %v242_v61 = vadd.f32 %v584_v26, %v241_v59  ;;  %v262_v62 = vadd.f32 %v584_v26, %v261_v60 }
  0xba   :  { %331 = vst.msk [vmem:[%s749_s3 + $0x98] sm:$0xff] %vm311_vm2, %v279_v57 }
  0xbb   :  { %339 = vst.msk [vmem:[%s749_s3 + $0xd8] sm:$0xff] %vm311_vm2, %v299_v58 }
  0xbc   :  { %316 = vst.msk [vmem:[%s749_s3 + $0x20] sm:$0xff] %vm311_vm2, %v242_v61 }
  0xbd   :  { %324 = vst.msk [vmem:[%s749_s3 + $0x60] sm:$0xff] %vm311_vm2, %v262_v62 }
  0xbf   :  { %v281_v63 = vpop.f32.mrf.mxu2  ;;  %v301_v0 = vpop.f32.mrf.mxu3 }
  0xc0   :  { %v282_v1 = vadd.f32 %v584_v26, %v281_v63  ;;  %v302_v2 = vadd.f32 %v584_v26, %v301_v0  ;;  %v243_v3 = vpop.f32.mrf.mxu0  ;;  %v263_v4 = vpop.f32.mrf.mxu1 }
  0xc1   :  { %v244_v5 = vadd.f32 %v584_v26, %v243_v3  ;;  %v264_v6 = vadd.f32 %v584_v26, %v263_v4 }
  0xc2   :  { %332 = vst.msk [vmem:[%s749_s3 + $0xa0] sm:$0xff] %vm311_vm2, %v282_v1 }
  0xc3   :  { %340 = vst.msk [vmem:[%s749_s3 + $0xe0] sm:$0xff] %vm311_vm2, %v302_v2 }
  0xc4   :  { %317 = vst.msk [vmem:[%s749_s3 + $0x28] sm:$0xff] %vm311_vm2, %v244_v5 }
  0xc5   :  { %325 = vst.msk [vmem:[%s749_s3 + $0x68] sm:$0xff] %vm311_vm2, %v264_v6 }
  0xc7   :  { %v283_v7 = vpop.f32.mrf.mxu2  ;;  %v303_v8 = vpop.f32.mrf.mxu3 }
  0xc8   :  { %v284_v9 = vadd.f32 %v584_v26, %v283_v7  ;;  %v304_v10 = vadd.f32 %v584_v26, %v303_v8  ;;  %v246_v11 = vpop.f32.mrf.mxu0  ;;  %v266_v12 = vpop.f32.mrf.mxu1 }
  0xc9   :  { %v247_v13 = vadd.f32 %v584_v26, %v246_v11  ;;  %v267_v14 = vadd.f32 %v584_v26, %v266_v12 }
  0xca   :  { %333 = vst.msk [vmem:[%s749_s3 + $0xa8] sm:$0xff] %vm311_vm2, %v284_v9 }
  0xcb   :  { %341 = vst.msk [vmem:[%s749_s3 + $0xe8] sm:$0xff] %vm311_vm2, %v304_v10 }
  0xcc   :  { %318 = vst.msk [vmem:[%s749_s3 + $0x30] sm:$0xff] %vm311_vm2, %v247_v13 }
  0xcd   :  { %326 = vst.msk [vmem:[%s749_s3 + $0x70] sm:$0xff] %vm311_vm2, %v267_v14 }
  0xcf   :  { %v286_v15 = vpop.f32.mrf.mxu2  ;;  %v306_v16 = vpop.f32.mrf.mxu3 }
  0xd0   :  { %v287_v17 = vadd.f32 %v584_v26, %v286_v15  ;;  %v307_v18 = vadd.f32 %v584_v26, %v306_v16  ;;  %v248_v19 = vpop.f32.mrf.mxu0  ;;  %v268_v20 = vpop.f32.mrf.mxu1 }
  0xd1   :  { %v249_v21 = vadd.f32 %v584_v26, %v248_v19  ;;  %v269_v22 = vadd.f32 %v584_v26, %v268_v20 }
  0xd2   :  { %334 = vst.msk [vmem:[%s749_s3 + $0xb0] sm:$0xff] %vm311_vm2, %v287_v17 }
  0xd3   :  { %342 = vst.msk [vmem:[%s749_s3 + $0xf0] sm:$0xff] %vm311_vm2, %v307_v18 }
  0xd4   :  { %319 = vst.msk [vmem:[%s749_s3 + $0x38] sm:$0xff] %vm311_vm2, %v249_v21 }
  0xd5   :  { %327 = vst.msk [vmem:[%s749_s3 + $0x78] sm:$0xff] %vm311_vm2, %v269_v22 }
  0xd7   :  { %v288_v23 = vpop.f32.mrf.mxu2  ;;  %v308_v24 = vpop.f32.mrf.mxu3 }
  0xd8   :  { %v289_v25 = vadd.f32 %v584_v26, %v288_v23  ;;  %v309_v27 = vadd.f32 %v584_v26, %v308_v24 }
  0xda   :  { %335 = vst.msk [vmem:[%s749_s3 + $0xb8] sm:$0xff] %vm311_vm2, %v289_v25 }
  0xdb   :  { %343 = vst.msk [vmem:[%s749_s3 + $0xf8] sm:$0xff] %vm311_vm2, %v309_v27 }

</bundles_post_ra>
